<compile_context>
chip_gen: v7x
topology: tpu7x:2x2x1
jax: 0.10.0
libtpu: 0.0.40
codegen_flags: <defaults>
</compile_context>

<pallas_src>
import functools
import re

import jax
import jax.numpy as jnp
from jax.experimental import pallas as pl
from jax.experimental.pallas import tpu as pltpu

HIDDEN = 64


def _round_up(n: int, m: int) -> int:
    return ((n + m - 1) // m) * m


def _tpu_generation() -> int:
    """Best-effort TPU generation from device_kind ('TPU v5 lite' -> 5, 'TPU v6e' -> 6)."""
    try:
        kind = jax.devices()[0].device_kind
    except Exception:
        return 0
    m = re.search(r"(\d+)", kind)
    return int(m.group(1)) if m else 0


def deepnet_kernel(x_ref,
                   w1_ref, b1_ref,
                   w2_ref, b2_ref,
                   w3_ref, b3_ref,
                   w4_ref, b4_ref,
                   w5t_ref, b5_ref,
                   o_ref,
                   *, bf16_act: bool):
    # x_ref: (1, T) f32 -- batch on the 128-lane axis, features on sublanes.
    x = x_ref[...]
    act_dtype = jnp.bfloat16 if bf16_act else jnp.float32

    # Layer 1 (in_features=1): VPU outer product instead of a K=1 MXU matmul.
    #   (64, 1) * (1, T) + (64, 1) -> (64, T)
    z = w1_ref[...] * x + b1_ref[...]
    h = jnp.tanh(z.astype(act_dtype))            # EUP tanh (bf16 on v6e/v7x, f32 on v5e)

    # Layers 2-4: 64x64 bf16 MXU matmuls with f32 accumulation, bias add in f32.
    # When bf16_act is True the astype below is a no-op (h is already bf16), so the
    # only per-layer cast is the single f32->bf16 before the tanh.
    for w_ref, b_ref in ((w2_ref, b2_ref), (w3_ref, b3_ref), (w4_ref, b4_ref)):
        z = jnp.dot(w_ref[...], h.astype(jnp.bfloat16),
                    preferred_element_type=jnp.float32) + b_ref[...]
        h = jnp.tanh(z.astype(act_dtype))

    # Layer 5 (out_features=1): multiply + sublane reduce, kept in f32 for the final
    # scalar accuracy.  (The MXU-padded (8,64) variant is intentionally not used: the
    # EUP, not VALU, is the binding slot here.)
    out = jnp.sum(w5t_ref[...] * h.astype(jnp.float32), axis=0, keepdims=True) + b5_ref[...]
    o_ref[...] = out.astype(o_ref.dtype)


def _auto_batch_tile(n: int, generation: int) -> int:
    # Per-generation VMEM-safe cap: v7x has 64 MiB physical VMEM, v5e/v6e have 128 MiB.
    cap = 8192 if generation >= 7 else 16384
    n128 = _round_up(max(int(n), 1), 128)
    # Prefer >= 2 lane-dense tiles (feeds both v7x TensorCores via the "parallel" grid
    # axis and overlaps the I/O DMA double-buffering); the cap keeps many grid steps
    # at production-size N.
    half = _round_up(pl.cdiv(n128, 2), 128)
    return int(min(cap, half))


def deepnet_forward(x, params, *, batch_tile=None, bf16_act=None):
    """x: (N, 1) float32.  params: list of (W, b) in PyTorch-native shapes
    (W: (out, in), b: (out,)).  Returns (N, 1) float32."""
    N = x.shape[0]
    gen = _tpu_generation()
    if batch_tile is None:
        batch_tile = _auto_batch_tile(N, gen)
    if bf16_act is None:
        # bf16 EUP/VPU only on v6e/v7x; v5e (and older) keep f32 elementwise math.
        bf16_act = gen >= 6

    (w1, b1), (w2, b2), (w3, b3), (w4, b4), (w5, b5) = params

    # Batch on the lane axis: (N,1) -> (1,N) is a pure reshape (no transpose copy).
    # Pad only when N is not a multiple of the tile.
    n_pad = pl.cdiv(N, batch_tile) * batch_tile
    xt = x.astype(jnp.float32).reshape(1, N)
    if n_pad != N:
        xt = jnp.pad(xt, ((0, 0), (0, n_pad - N)))

    # Kernel-side parameter layout:
    #   w1  : (64, 1)  f32   (VPU outer product)
    #   w2-4: (64, 64) bf16  (MXU operands)
    #   w5t : (64, 1)  f32   (multiply + f32 sublane reduce)
    #   b*  : (out, 1) f32
    args = (
        xt,
        w1.astype(jnp.float32),   b1.reshape(HIDDEN, 1).astype(jnp.float32),
        w2.astype(jnp.bfloat16),  b2.reshape(HIDDEN, 1).astype(jnp.float32),
        w3.astype(jnp.bfloat16),  b3.reshape(HIDDEN, 1).astype(jnp.float32),
        w4.astype(jnp.bfloat16),  b4.reshape(HIDDEN, 1).astype(jnp.float32),
        w5.T.astype(jnp.float32), b5.reshape(1, 1).astype(jnp.float32),
    )

    # Weights/biases: full-array blocks at a constant block index -> Pallas skips the
    # re-DMA when the block index does not change between grid steps, so they are
    # fetched once (~40 KiB total).
    def rep(a):
        nd = a.ndim
        return pl.BlockSpec(a.shape, lambda i, _nd=nd: (0,) * _nd)

    in_specs = [pl.BlockSpec((1, batch_tile), lambda i: (0, i))]
    in_specs += [rep(a) for a in args[1:]]
    out_spec = pl.BlockSpec((1, batch_tile), lambda i: (0, i))

    # Generous but generation-safe scoped-VMEM limit; peak live state at the chosen
    # tiles (a few f32 (64, T) intermediates + double-buffered (1, T) I/O) is far below.
    vmem_limit = (48 << 20) if gen >= 7 else (96 << 20)

    out = pl.pallas_call(
        functools.partial(deepnet_kernel, bf16_act=bf16_act),
        out_shape=jax.ShapeDtypeStruct((1, n_pad), jnp.float32),
        grid_spec=pltpu.PrefetchScalarGridSpec(
            num_scalar_prefetch=0,
            grid=(n_pad // batch_tile,),
            in_specs=in_specs,
            out_specs=out_spec,
        ),
        compiler_params=pltpu.CompilerParams(
            dimension_semantics=("parallel",),
            vmem_limit_bytes=vmem_limit,
        ),
    )(*args)

    if n_pad != N:
        out = out[:, :N]
    return out.reshape(N, 1)


def init_params(key):
    """PyTorch nn.Linear-style params: W (out, in), b (out,), U(-1/sqrt(in), 1/sqrt(in))."""
    sizes = [(HIDDEN, 1), (HIDDEN, HIDDEN), (HIDDEN, HIDDEN), (HIDDEN, HIDDEN), (1, HIDDEN)]
    params = []
    for (fan_out, fan_in) in sizes:
        key, kw, kb = jax.random.split(key, 3)
        bound = 1.0 / (fan_in ** 0.5)
        w = jax.random.uniform(kw, (fan_out, fan_in), jnp.float32, -bound, bound)
        b = jax.random.uniform(kb, (fan_out,), jnp.float32, -bound, bound)
        params.append((w, b))
    return params


def deepnet_ref_f32(x, params):
    """Pure f32 reference matching the PyTorch module semantics."""
    h = x
    for i, (w, b) in enumerate(params):
        h = h @ w.T + b
        if i < len(params) - 1:
            h = jnp.tanh(h)
    return h


def deepnet_ref_mixed(x, params, *, bf16_act):
    """Reference with the same mixed precision as the kernel (bf16 64x64 matmuls,
    and bf16 tanh when bf16_act is True)."""
    act_dtype = jnp.bfloat16 if bf16_act else jnp.float32
    h = x
    for i, (w, b) in enumerate(params):
        if w.shape == (HIDDEN, HIDDEN):
            z = jnp.dot(h.astype(jnp.bfloat16), w.T.astype(jnp.bfloat16),
                        preferred_element_type=jnp.float32) + b
        else:
            z = h.astype(jnp.float32) @ w.T + b
        h = jnp.tanh(z.astype(act_dtype)) if i < len(params) - 1 else z
    return h


if __name__ == "__main__":
    key = jax.random.PRNGKey(0)
    kx, kp = jax.random.split(key)

    N = 1024                       # small demo batch; auto tile -> 512 => 2 grid steps
    x = jax.random.normal(kx, (N, 1), jnp.float32)
    params = init_params(kp)

    gen = _tpu_generation()
    bf16_act = gen >= 6

    out = deepnet_forward(x, params)     # per-generation auto tile / activation dtype
    out = jax.block_until_ready(out)
    assert out.shape == (N, 1), out.shape

    # Tight check vs. a reference with identical mixed precision.
    ref_mixed = deepnet_ref_mixed(x, params, bf16_act=bf16_act)
    err_mixed = float(jnp.max(jnp.abs(out - ref_mixed)))
    assert err_mixed < 4e-2, err_mixed

    # Loose semantic check vs. the pure-f32 PyTorch-equivalent forward.
    ref_f32 = deepnet_ref_f32(x, params)
    err_f32 = float(jnp.max(jnp.abs(out - ref_f32)))
    assert err_f32 < 1e-1, err_f32

    print("KERNEL_OK")
</pallas_src>

<mosaic_0001>
module attributes {stable_mosaic.version = 11 : i64} {
  func.func @deepnet_kernel(%arg0: i32, %arg1: memref<1x512xf32, #tpu.memory_space<vmem>>, %arg2: memref<64x1xf32, #tpu.memory_space<vmem>>, %arg3: memref<64x1xf32, #tpu.memory_space<vmem>>, %arg4: memref<64x64xbf16, #tpu.memory_space<vmem>>, %arg5: memref<64x1xf32, #tpu.memory_space<vmem>>, %arg6: memref<64x64xbf16, #tpu.memory_space<vmem>>, %arg7: memref<64x1xf32, #tpu.memory_space<vmem>>, %arg8: memref<64x64xbf16, #tpu.memory_space<vmem>>, %arg9: memref<64x1xf32, #tpu.memory_space<vmem>>, %arg10: memref<64x1xf32, #tpu.memory_space<vmem>>, %arg11: memref<1x1xf32, #tpu.memory_space<vmem>>, %arg12: memref<1x512xf32, #tpu.memory_space<vmem>>) attributes {dimension_semantics = [#tpu.dimension_semantics<parallel>], iteration_bounds = array<i64: 2>, scalar_prefetch = 0 : i64, scratch_operands = 0 : i64, tpu.core_type = #tpu.core_type<tc>, window_params = [{transform_indices = @transform_0, window_bounds = array<i64: 1, 512>}, {pipeline_mode = #tpu.pipeline_mode<synchronous>, transform_indices = @transform_1, window_bounds = array<i64: 64, 1>}, {pipeline_mode = #tpu.pipeline_mode<synchronous>, transform_indices = @transform_2, window_bounds = array<i64: 64, 1>}, {pipeline_mode = #tpu.pipeline_mode<synchronous>, transform_indices = @transform_3, window_bounds = array<i64: 64, 64>}, {pipeline_mode = #tpu.pipeline_mode<synchronous>, transform_indices = @transform_4, window_bounds = array<i64: 64, 1>}, {pipeline_mode = #tpu.pipeline_mode<synchronous>, transform_indices = @transform_5, window_bounds = array<i64: 64, 64>}, {pipeline_mode = #tpu.pipeline_mode<synchronous>, transform_indices = @transform_6, window_bounds = array<i64: 64, 1>}, {pipeline_mode = #tpu.pipeline_mode<synchronous>, transform_indices = @transform_7, window_bounds = array<i64: 64, 64>}, {pipeline_mode = #tpu.pipeline_mode<synchronous>, transform_indices = @transform_8, window_bounds = array<i64: 64, 1>}, {pipeline_mode = #tpu.pipeline_mode<synchronous>, transform_indices = @transform_9, window_bounds = array<i64: 64, 1>}, {pipeline_mode = #tpu.pipeline_mode<synchronous>, transform_indices = @transform_10, window_bounds = array<i64: 1, 1>}, {transform_indices = @transform_11, window_bounds = array<i64: 1, 512>}]} {
    %c0 = arith.constant 0 : index
    %c0_0 = arith.constant 0 : index
    %0 = vector.load %arg1[%c0, %c0_0] : memref<1x512xf32, #tpu.memory_space<vmem>>, vector<1x512xf32>
    %c0_1 = arith.constant 0 : index
    %c0_2 = arith.constant 0 : index
    %1 = vector.load %arg2[%c0_1, %c0_2] : memref<64x1xf32, #tpu.memory_space<vmem>>, vector<64x1xf32>
    %2 = vector.broadcast %1 : vector<64x1xf32> to vector<64x512xf32>
    %3 = vector.broadcast %0 : vector<1x512xf32> to vector<64x512xf32>
    %4 = arith.mulf %2, %3 : vector<64x512xf32>
    %c0_3 = arith.constant 0 : index
    %c0_4 = arith.constant 0 : index
    %5 = vector.load %arg3[%c0_3, %c0_4] : memref<64x1xf32, #tpu.memory_space<vmem>>, vector<64x1xf32>
    %6 = vector.broadcast %5 : vector<64x1xf32> to vector<64x512xf32>
    %7 = arith.addf %4, %6 : vector<64x512xf32>
    %8 = math.tanh %7 : vector<64x512xf32>
    %c0_5 = arith.constant 0 : index
    %c0_6 = arith.constant 0 : index
    %9 = vector.load %arg4[%c0_5, %c0_6] : memref<64x64xbf16, #tpu.memory_space<vmem>>, vector<64x64xbf16>
    %10 = arith.truncf %8 : vector<64x512xf32> to vector<64x512xbf16>
    %cst = arith.constant dense<0.000000e+00> : vector<64x512xf32>
    %11 = tpu.matmul %9, %10, %cst {dimension_numbers = #tpu.dot_dimension_numbers<[1], [0], [0], [1], [0, 0, 1, 1], [], []>} : vector<64x64xbf16>, vector<64x512xbf16>, vector<64x512xf32> -> vector<64x512xf32>
    %c0_7 = arith.constant 0 : index
    %c0_8 = arith.constant 0 : index
    %12 = vector.load %arg5[%c0_7, %c0_8] : memref<64x1xf32, #tpu.memory_space<vmem>>, vector<64x1xf32>
    %13 = vector.broadcast %12 : vector<64x1xf32> to vector<64x512xf32>
    %14 = arith.addf %11, %13 : vector<64x512xf32>
    %15 = math.tanh %14 : vector<64x512xf32>
    %c0_9 = arith.constant 0 : index
    %c0_10 = arith.constant 0 : index
    %16 = vector.load %arg6[%c0_9, %c0_10] : memref<64x64xbf16, #tpu.memory_space<vmem>>, vector<64x64xbf16>
    %17 = arith.truncf %15 : vector<64x512xf32> to vector<64x512xbf16>
    %cst_11 = arith.constant dense<0.000000e+00> : vector<64x512xf32>
    %18 = tpu.matmul %16, %17, %cst_11 {dimension_numbers = #tpu.dot_dimension_numbers<[1], [0], [0], [1], [0, 0, 1, 1], [], []>} : vector<64x64xbf16>, vector<64x512xbf16>, vector<64x512xf32> -> vector<64x512xf32>
    %c0_12 = arith.constant 0 : index
    %c0_13 = arith.constant 0 : index
    %19 = vector.load %arg7[%c0_12, %c0_13] : memref<64x1xf32, #tpu.memory_space<vmem>>, vector<64x1xf32>
    %20 = vector.broadcast %19 : vector<64x1xf32> to vector<64x512xf32>
    %21 = arith.addf %18, %20 : vector<64x512xf32>
    %22 = math.tanh %21 : vector<64x512xf32>
    %c0_14 = arith.constant 0 : index
    %c0_15 = arith.constant 0 : index
    %23 = vector.load %arg8[%c0_14, %c0_15] : memref<64x64xbf16, #tpu.memory_space<vmem>>, vector<64x64xbf16>
    %24 = arith.truncf %22 : vector<64x512xf32> to vector<64x512xbf16>
    %cst_16 = arith.constant dense<0.000000e+00> : vector<64x512xf32>
    %25 = tpu.matmul %23, %24, %cst_16 {dimension_numbers = #tpu.dot_dimension_numbers<[1], [0], [0], [1], [0, 0, 1, 1], [], []>} : vector<64x64xbf16>, vector<64x512xbf16>, vector<64x512xf32> -> vector<64x512xf32>
    %c0_17 = arith.constant 0 : index
    %c0_18 = arith.constant 0 : index
    %26 = vector.load %arg9[%c0_17, %c0_18] : memref<64x1xf32, #tpu.memory_space<vmem>>, vector<64x1xf32>
    %27 = vector.broadcast %26 : vector<64x1xf32> to vector<64x512xf32>
    %28 = arith.addf %25, %27 : vector<64x512xf32>
    %29 = math.tanh %28 : vector<64x512xf32>
    %c0_19 = arith.constant 0 : index
    %c0_20 = arith.constant 0 : index
    %30 = vector.load %arg10[%c0_19, %c0_20] : memref<64x1xf32, #tpu.memory_space<vmem>>, vector<64x1xf32>
    %31 = vector.broadcast %30 : vector<64x1xf32> to vector<64x512xf32>
    %32 = arith.mulf %31, %29 : vector<64x512xf32>
    %cst_21 = arith.constant dense<0.000000e+00> : vector<512xf32>
    %33 = vector.multi_reduction <add>, %32, %cst_21 [0] : vector<64x512xf32> to vector<512xf32>
    %34 = vector.shape_cast %33 : vector<512xf32> to vector<1x512xf32>
    %c0_22 = arith.constant 0 : index
    %c0_23 = arith.constant 0 : index
    %35 = vector.load %arg11[%c0_22, %c0_23] : memref<1x1xf32, #tpu.memory_space<vmem>>, vector<1x1xf32>
    %36 = vector.broadcast %35 : vector<1x1xf32> to vector<1x512xf32>
    %37 = arith.addf %34, %36 : vector<1x512xf32>
    %c0_24 = arith.constant 0 : index
    %c0_25 = arith.constant 0 : index
    %38 = vector.load %arg12[%c0_24, %c0_25] : memref<1x512xf32, #tpu.memory_space<vmem>>, vector<1x512xf32>
    tpu.vector_store %arg12[%c0_24, %c0_25], %37 {strides = array<i32>} : memref<1x512xf32, #tpu.memory_space<vmem>>, vector<1x512xf32>,
    return
  }
  func.func @transform_0(%arg0: i32) -> (i32, i32) {
    %c0_i32 = arith.constant 0 : i32
    %c0_i32_0 = arith.constant 0 : i32
    return %c0_i32, %arg0 : i32, i32
  }
  func.func @transform_1(%arg0: i32) -> (i32, i32) {
    %c0_i32 = arith.constant 0 : i32
    %c0_i32_0 = arith.constant 0 : i32
    %c0_i32_1 = arith.constant 0 : i32
    return %c0_i32, %c0_i32_0 : i32, i32
  }
  func.func @transform_2(%arg0: i32) -> (i32, i32) {
    %c0_i32 = arith.constant 0 : i32
    %c0_i32_0 = arith.constant 0 : i32
    %c0_i32_1 = arith.constant 0 : i32
    return %c0_i32, %c0_i32_0 : i32, i32
  }
  func.func @transform_3(%arg0: i32) -> (i32, i32) {
    %c0_i32 = arith.constant 0 : i32
    %c0_i32_0 = arith.constant 0 : i32
    %c0_i32_1 = arith.constant 0 : i32
    return %c0_i32, %c0_i32_0 : i32, i32
  }
  func.func @transform_4(%arg0: i32) -> (i32, i32) {
    %c0_i32 = arith.constant 0 : i32
    %c0_i32_0 = arith.constant 0 : i32
    %c0_i32_1 = arith.constant 0 : i32
    return %c0_i32, %c0_i32_0 : i32, i32
  }
  func.func @transform_5(%arg0: i32) -> (i32, i32) {
    %c0_i32 = arith.constant 0 : i32
    %c0_i32_0 = arith.constant 0 : i32
    %c0_i32_1 = arith.constant 0 : i32
    return %c0_i32, %c0_i32_0 : i32, i32
  }
  func.func @transform_6(%arg0: i32) -> (i32, i32) {
    %c0_i32 = arith.constant 0 : i32
    %c0_i32_0 = arith.constant 0 : i32
    %c0_i32_1 = arith.constant 0 : i32
    return %c0_i32, %c0_i32_0 : i32, i32
  }
  func.func @transform_7(%arg0: i32) -> (i32, i32) {
    %c0_i32 = arith.constant 0 : i32
    %c0_i32_0 = arith.constant 0 : i32
    %c0_i32_1 = arith.constant 0 : i32
    return %c0_i32, %c0_i32_0 : i32, i32
  }
  func.func @transform_8(%arg0: i32) -> (i32, i32) {
    %c0_i32 = arith.constant 0 : i32
    %c0_i32_0 = arith.constant 0 : i32
    %c0_i32_1 = arith.constant 0 : i32
    return %c0_i32, %c0_i32_0 : i32, i32
  }
  func.func @transform_9(%arg0: i32) -> (i32, i32) {
    %c0_i32 = arith.constant 0 : i32
    %c0_i32_0 = arith.constant 0 : i32
    %c0_i32_1 = arith.constant 0 : i32
    return %c0_i32, %c0_i32_0 : i32, i32
  }
  func.func @transform_10(%arg0: i32) -> (i32, i32) {
    %c0_i32 = arith.constant 0 : i32
    %c0_i32_0 = arith.constant 0 : i32
    %c0_i32_1 = arith.constant 0 : i32
    return %c0_i32, %c0_i32_0 : i32, i32
  }
  func.func @transform_11(%arg0: i32) -> (i32, i32) {
    %c0_i32 = arith.constant 0 : i32
    %c0_i32_0 = arith.constant 0 : i32
    return %c0_i32, %arg0 : i32, i32
  }
}

</mosaic_0001>

<bundles_post_ra>
// kernel: tpu_custom_call.1
= control target key start
LH: loop header
LB: loop body
LE: loop exit
PB: predicated region body
PF: predicated region fallthrough
CT: control target
= control target key end

     0   :  { %s3417_s0 = inlined_call_operand.hbm [shape: f32[1,1024], index: 0, kind: input, shape index: {}]   ;;  %s3418_s1 = inlined_call_operand.hbm [shape: f32[64,1], index: 1, kind: input, shape index: {}]   ;;  %s3419_s2 = inlined_call_operand.hbm [shape: f32[64,1], index: 2, kind: input, shape index: {}]   ;;  %s3420_s3 = inlined_call_operand.hbm [shape: bf16[64,64], index: 3, kind: input, shape index: {}]   ;;  %s3421_s4 = inlined_call_operand.hbm [shape: f32[64,1], index: 4, kind: input, shape index: {}]   ;;  %s3422_s5 = inlined_call_operand.hbm [shape: bf16[64,64], index: 5, kind: input, shape index: {}]   ;;  %s3423_s6 = inlined_call_operand.hbm [shape: f32[64,1], index: 6, kind: input, shape index: {}]   ;;  %s3424_s7 = inlined_call_operand.hbm [shape: bf16[64,64], index: 7, kind: input, shape index: {}]   ;;  %s3425_s8 = inlined_call_operand.hbm [shape: f32[64,1], index: 8, kind: input, shape index: {}]   ;;  %s3426_s9 = inlined_call_operand.hbm [shape: f32[64,1], index: 9, kind: input, shape index: {}]   ;;  %s3427_s10 = inlined_call_operand.<no memory space> [shape: f32[1,1], index: 10, kind: input, shape index: {}]   ;;  %s3428_s11 = inlined_call_operand.hbm [shape: f32[1,1024], index: 11, kind: output, shape index: {}]  }
   0x1   :  { %3438 = sst [smem:[#allocation29_spill]] %s3418_s1  ;;  %v16_v0 = vstv %s3427_s10 }
   0x2   :  { %3439 = sst [smem:[#allocation30_spill]] %s3428_s11  ;;  %17 = vst [vmem:[#allocation2] sm:$0x1] %v16_v0 }
   0x3   :  { %18 = vsyncpa [#allocation4], 0 }
   0x4   :  { %20 = vsyncpa [#allocation4 + $0x1], 0 }
   0x5   :  { %21 = vsyncpa [#allocation7], 0 }
   0x6   :  { %22 = vsyncpa [#allocation10], 0 }
   0x7   :  { %23 = vsyncpa [#allocation13], 0 }
   0x8   :  { %24 = vsyncpa [#allocation16], 0 }
   0x9   :  { %25 = vsyncpa [#allocation19], 0 }
   0xa   :  { %26 = vsyncpa [#allocation5], 0 }
   0xb   :  { %28 = vsyncpa [#allocation5 + $0x1], 0  ;;  %s2884_s19 = smov 0   ;;  %s2886_s20 = smov 0  }
   0xc   :  { %s2888_s21 = smov 0   ;;  %s2890_s22 = smov 0  }
   0xd LB: > { %s2804_s10 = smov [#allocation6]   ;;  %s2905_s24 = sadd.s32 4294967295, %s2802_s22   ;;  %s2802_s22 = sphi %s2890_s22, %s3471_s22   ;;  %s2798_s21 = sphi %s2888_s21, %s3470_s21   ;;  %s2794_s20 = sphi %s2886_s20, %s3469_s20   ;;  %s2790_s19 = sphi %s2884_s19, %s3468_s19  }
   0xe   : > { %s313_s23 = sshll.u32 %s2804_s10, 4  ;;  %p1952_p0 = scmp.ge.s32.totalorder %s2802_s22, 1  ;;  %s2910_s23 = int_to_ptr.vmem [resolvable:$true] %s313_s23 }
   0xf   : > { %p3433_p1 = scmp.eq.s32.totalorder %s2905_s24, 0  ;;  %p301_p2 = scmp.lt.s32.totalorder %s2802_s22, 3 }
  0x10   : > { %s2805_s26 = smov [#allocation9]   ;;  %s2806_s29 = smov [#allocation12]  }
  0x11   : > { %p2912_p3 = pnand %p1952_p0, %p301_p2  ;;  %s339_s27 = sshll.u32 %s2805_s26, 4  ;;  %s2925_s27 = int_to_ptr.vmem [resolvable:$true] %s339_s27 }
  0x12   : > { %s2927_s30 = sshll.u32 %s2806_s29, 4  ;;  %s3443_s1 = sld [smem:[#allocation29_spill]]  ;;  %s366_s30 = int_to_ptr.vmem [resolvable:$true] %s2927_s30 }
  0x13   : > { %s3440_s25 = scalar_select %p2912_p3, 1, 0 }
  0x14   : > { %p2061_p5 = pneg %p2912_p3 }
  0x15   : > { %3441 = sst [smem:[#allocation28_spill]] %s3440_s25 }
  0x16   : > { %p2921_p6 = pnand %p2061_p5, %p3433_p1 }
  0x18   : > { %s2434_s14 = scalar_lea.hbm %s3443_s1, 1024  ;;  %p2937_p8 = pneg %p2921_p6 }
  0x19   : > { %p2435_p7 = scmp.ne.s32.totalorder %s3443_s1, %s2434_s14  ;;  %p2441_p11 = scmp.lt.u32.totalorder %s2434_s14, %s3443_s1 }
  0x1b   : > { %p2437_p9 = pnand %p2937_p8, %p2435_p7 }
  0x1d   : > { %p2438_p10 = pneg %p2437_p9 }
  0x1f   : > { %p2443_p12 = pnand %p2441_p11, %p2438_p10 }
  0x21   : > { %2446 = shalt.err (!%p2443_p12)
}
  0x22   : > { %s2447_s26 = scalar_lea.vmem %s2910_s23, 1024  ;;  %p2455_p5 = scmp.lt.s32.totalorder %s2910_s23, %s2910_s23 }
  0x23   : > { %p2448_p13 = scmp.ne.s32.totalorder %s2910_s23, %s2447_s26  ;;  %p2456_p4 = scmp.lt.s32.totalorder %s2447_s26, %s2447_s26 }
  0x25   : > { %p2450_p0 = pnand %p2448_p13, %p2937_p8  ;;  %p2457_p7 = por %p2456_p4, %p2455_p5 }
  0x27   : > { %p2451_p2 = pneg %p2450_p0 }
  0x29   : > { %p2458_p9 = pnand %p2457_p7, %p2451_p2 }
  0x2b   : > { %2461 = shalt.err (!%p2458_p9)
}
  0x2c   : > { %s3431_s29 = smov 128   ;;  %s3435_s12 = smov 8  }
  0x2d   : > { %2064 = dma.hbm_to_vmem [thread:$0]  (!%p2921_p6), %s3443_s1, 1024, %s2910_s23, [#allocation7], %s3431_s29, %s3431_s29, %s3435_s12  }
  0x2e   : > { %s2462_s18 = scalar_lea.hbm %s3420_s3, 512 }
  0x2f   : > { %p2463_p4 = scmp.ne.s32.totalorder %s3420_s3, %s2462_s18  ;;  %p2469_p12 = scmp.lt.u32.totalorder %s2462_s18, %s3420_s3 }
  0x31   : > { %p2465_p10 = pnand %p2463_p4, %p2937_p8 }
  0x33   : > { %p2466_p11 = pneg %p2465_p10 }
  0x35   : > { %p2471_p13 = pnand %p2469_p12, %p2466_p11 }
  0x37   : > { %2474 = shalt.err (!%p2471_p13)
}
  0x38   : > { %s2475_s23 = scalar_lea.vmem %s2925_s27, 512  ;;  %p2483_p7 = scmp.lt.s32.totalorder %s2925_s27, %s2925_s27 }
  0x39   : > { %p2476_p0 = scmp.ne.s32.totalorder %s2925_s27, %s2475_s23  ;;  %p2484_p9 = scmp.lt.s32.totalorder %s2475_s23, %s2475_s23 }
  0x3b   : > { %p2478_p2 = pnand %p2476_p0, %p2937_p8  ;;  %p2485_p4 = por %p2484_p9, %p2483_p7 }
  0x3d   : > { %p2479_p5 = pneg %p2478_p2 }
  0x3f   : > { %p2486_p10 = pnand %p2485_p4, %p2479_p5 }
  0x41   : > { %2489 = shalt.err (!%p2486_p10)
}
  0x42   : > { %s2809_s13 = smov 64   ;;  %s2810_s11 = smov 4  }
  0x43   : > { %2070 = dma.hbm_to_vmem [thread:$0]  (!%p2921_p6), %s3420_s3, 512, %s2925_s27, [#allocation10], %s2809_s13, %s2809_s13, %s2810_s11  }
  0x44   : > { %s2490_s18 = scalar_lea.hbm %s3422_s5, 512 }
  0x45   : > { %p2491_p11 = scmp.ne.s32.totalorder %s3422_s5, %s2490_s18  ;;  %p2497_p0 = scmp.lt.u32.totalorder %s2490_s18, %s3422_s5 }
  0x47   : > { %p2493_p12 = pnand %p2491_p11, %p2937_p8 }
  0x49   : > { %p2494_p13 = pneg %p2493_p12 }
  0x4b   : > { %p2499_p2 = pnand %p2497_p0, %p2494_p13 }
  0x4d   : > { %2502 = shalt.err (!%p2499_p2)
}
  0x4e   : > { %s2503_s25 = scalar_lea.vmem %s366_s30, 512  ;;  %p2511_p4 = scmp.lt.s32.totalorder %s366_s30, %s366_s30 }
  0x4f   : > { %p2504_p5 = scmp.ne.s32.totalorder %s366_s30, %s2503_s25  ;;  %p2512_p10 = scmp.lt.s32.totalorder %s2503_s25, %s2503_s25 }
  0x51   : > { %p2506_p7 = pnand %p2504_p5, %p2937_p8  ;;  %p2513_p1 = por %p2512_p10, %p2511_p4 }
  0x53   : > { %p2507_p9 = pneg %p2506_p7 }
  0x55   : > { %p2514_p3 = pnand %p2513_p1, %p2507_p9 }
  0x57   : > { %2517 = shalt.err (!%p2514_p3)
}
  0x58   : > { %2076 = dma.hbm_to_vmem [thread:$0]  (!%p2921_p6), %s3422_s5, 512, %s366_s30, [#allocation13], %s2809_s13, %s2809_s13, %s2810_s11  }
  0x59   : > { %s2811_s14 = smov [#allocation15]   ;;  %s2812_s16 = smov [#allocation8]  }
  0x5a   : > { %s391_s15 = sshll.u32 %s2811_s14, 4  ;;  %s326_s18 = sshll.u32 %s2812_s16, 4  ;;  %s392_s15 = int_to_ptr.vmem [resolvable:$true] %s391_s15  ;;  %s327_s18 = int_to_ptr.vmem [resolvable:$true] %s326_s18 }
  0x5b   : > { %s2518_s23 = scalar_lea.hbm %s3424_s7, 512 }
  0x5c   : > { %p2519_p1 = scmp.ne.s32.totalorder %s3424_s7, %s2518_s23  ;;  %p2525_p12 = scmp.lt.u32.totalorder %s2518_s23, %s3424_s7 }
  0x5e   : > { %p2521_p3 = pnand %p2519_p1, %p2937_p8 }
  0x60   : > { %p2522_p11 = pneg %p2521_p3 }
  0x62   : > { %p2527_p13 = pnand %p2525_p12, %p2522_p11 }
  0x64   : > { %2530 = shalt.err (!%p2527_p13)
}
  0x65   : > { %s2531_s30 = scalar_lea.vmem %s392_s15, 512  ;;  %p2539_p7 = scmp.lt.s32.totalorder %s392_s15, %s392_s15 }
  0x66   : > { %p2532_p0 = scmp.ne.s32.totalorder %s392_s15, %s2531_s30  ;;  %p2540_p9 = scmp.lt.s32.totalorder %s2531_s30, %s2531_s30 }
  0x68   : > { %p2534_p2 = pnand %p2532_p0, %p2937_p8  ;;  %p2541_p4 = por %p2540_p9, %p2539_p7 }
  0x6a   : > { %p2535_p5 = pneg %p2534_p2 }
  0x6c   : > { %p2542_p10 = pnand %p2541_p4, %p2535_p5 }
  0x6e   : > { %2545 = shalt.err (!%p2542_p10)
}
  0x6f   : > { %2082 = dma.hbm_to_vmem [thread:$0]  (!%p2921_p6), %s3424_s7, 512, %s392_s15, [#allocation16], %s2809_s13, %s2809_s13, %s2810_s11  }
  0x70   : > { %s2546_s16 = scalar_lea.hbm %s3419_s2, 1024 }
  0x71   : > { %p2547_p1 = scmp.ne.s32.totalorder %s3419_s2, %s2546_s16  ;;  %p2553_p12 = scmp.lt.u32.totalorder %s2546_s16, %s3419_s2 }
  0x73   : > { %p2549_p3 = pnand %p2547_p1, %p2937_p8 }
  0x75   : > { %p2550_p11 = pneg %p2549_p3 }
  0x77   : > { %p2555_p13 = pnand %p2553_p12, %p2550_p11 }
  0x79   : > { %2558 = shalt.err (!%p2555_p13)
}
  0x7a   : > { %s2559_s27 = scalar_lea.vmem %s327_s18, 1024  ;;  %p2567_p7 = scmp.lt.s32.totalorder %s327_s18, %s327_s18 }
  0x7b   : > { %p2560_p0 = scmp.ne.s32.totalorder %s327_s18, %s2559_s27  ;;  %p2568_p9 = scmp.lt.s32.totalorder %s2559_s27, %s2559_s27 }
  0x7d   : > { %p2562_p2 = pnand %p2560_p0, %p2937_p8  ;;  %p2569_p4 = por %p2568_p9, %p2567_p7 }
  0x7f   : > { %p2563_p5 = pneg %p2562_p2 }
  0x81   : > { %p2570_p10 = pnand %p2569_p4, %p2563_p5 }
  0x83   : > { %2573 = shalt.err (!%p2570_p10)
}
  0x84   : > { %s3445_s13 = smov 8   ;;  %s3446_s11 = smov 128  }
  0x85   : > { %2067 = dma.hbm_to_vmem [thread:$0]  (!%p2921_p6), %s3419_s2, 1024, %s327_s18, [#allocation7], %s3446_s11, %s3446_s11, %s3445_s13  }
  0x86   : > { %s2813_s1 = smov [#allocation11]   ;;  %s2814_s29 = smov [#allocation14]  }
  0x87   : > { %s352_s12 = sshll.u32 %s2813_s1, 4  ;;  %s378_s14 = sshll.u32 %s2814_s29, 4  ;;  %s353_s12 = int_to_ptr.vmem [resolvable:$true] %s352_s12  ;;  %s379_s14 = int_to_ptr.vmem [resolvable:$true] %s378_s14 }
  0x88   : > { %s2574_s26 = scalar_lea.hbm %s3421_s4, 1024 }
  0x89   : > { %p2575_p1 = scmp.ne.s32.totalorder %s3421_s4, %s2574_s26  ;;  %p2581_p12 = scmp.lt.u32.totalorder %s2574_s26, %s3421_s4 }
  0x8b   : > { %p2577_p3 = pnand %p2575_p1, %p2937_p8 }
  0x8d   : > { %p2578_p11 = pneg %p2577_p3 }
  0x8f   : > { %p2583_p13 = pnand %p2581_p12, %p2578_p11 }
  0x91   : > { %2586 = shalt.err (!%p2583_p13)
}
  0x92   : > { %s2587_s18 = scalar_lea.vmem %s353_s12, 1024  ;;  %p2595_p7 = scmp.lt.s32.totalorder %s353_s12, %s353_s12 }
  0x93   : > { %p2588_p0 = scmp.ne.s32.totalorder %s353_s12, %s2587_s18  ;;  %p2596_p9 = scmp.lt.s32.totalorder %s2587_s18, %s2587_s18 }
  0x95   : > { %p2590_p2 = pnand %p2588_p0, %p2937_p8  ;;  %p2597_p4 = por %p2596_p9, %p2595_p7 }
  0x97   : > { %p2591_p5 = pneg %p2590_p2 }
  0x99   : > { %p2598_p10 = pnand %p2597_p4, %p2591_p5 }
  0x9b   : > { %2601 = shalt.err (!%p2598_p10)
}
  0x9c   : > { %2073 = dma.hbm_to_vmem [thread:$0]  (!%p2921_p6), %s3421_s4, 1024, %s353_s12, [#allocation10], %s3446_s11, %s3446_s11, %s3445_s13  }
  0x9d   : > { %s2602_s10 = scalar_lea.hbm %s3423_s6, 1024 }
  0x9e   : > { %p2603_p1 = scmp.ne.s32.totalorder %s3423_s6, %s2602_s10  ;;  %p2609_p12 = scmp.lt.u32.totalorder %s2602_s10, %s3423_s6 }
  0xa0   : > { %p2605_p3 = pnand %p2603_p1, %p2937_p8 }
  0xa2   : > { %p2606_p11 = pneg %p2605_p3 }
  0xa4   : > { %p2611_p13 = pnand %p2609_p12, %p2606_p11 }
  0xa6   : > { %2614 = shalt.err (!%p2611_p13)
}
  0xa7   : > { %s2615_s15 = scalar_lea.vmem %s379_s14, 1024  ;;  %p2623_p7 = scmp.lt.s32.totalorder %s379_s14, %s379_s14 }
  0xa8   : > { %p2616_p0 = scmp.ne.s32.totalorder %s379_s14, %s2615_s15  ;;  %p2624_p9 = scmp.lt.s32.totalorder %s2615_s15, %s2615_s15 }
  0xaa   : > { %p2618_p2 = pnand %p2616_p0, %p2937_p8  ;;  %p2625_p4 = por %p2624_p9, %p2623_p7 }
  0xac   : > { %p2619_p5 = pneg %p2618_p2 }
  0xae   : > { %p2626_p10 = pnand %p2625_p4, %p2619_p5 }
  0xb0   : > { %2629 = shalt.err (!%p2626_p10)
}
  0xb1   : > { %2079 = dma.hbm_to_vmem [thread:$0]  (!%p2921_p6), %s3423_s6, 1024, %s379_s14, [#allocation13], %s3446_s11, %s3446_s11, %s3445_s13  }
  0xb2   : > { %s2815_s30 = smov [#allocation17]   ;;  %s2816_s29 = smov [#allocation18]  }
  0xb3   : > { %s404_s1 = sshll.u32 %s2815_s30, 4  ;;  %s417_s16 = sshll.u32 %s2816_s29, 4  ;;  %s405_s1 = int_to_ptr.vmem [resolvable:$true] %s404_s1  ;;  %s418_s16 = int_to_ptr.vmem [resolvable:$true] %s417_s16 }
  0xb4   : > { %s2630_s23 = scalar_lea.hbm %s3425_s8, 1024 }
  0xb5   : > { %p2631_p1 = scmp.ne.s32.totalorder %s3425_s8, %s2630_s23  ;;  %p2637_p12 = scmp.lt.u32.totalorder %s2630_s23, %s3425_s8 }
  0xb7   : > { %p2633_p3 = pnand %p2631_p1, %p2937_p8 }
  0xb9   : > { %p2634_p11 = pneg %p2633_p3 }
  0xbb   : > { %p2639_p13 = pnand %p2637_p12, %p2634_p11 }
  0xbd   : > { %2642 = shalt.err (!%p2639_p13)
}
  0xbe   : > { %s2643_s14 = scalar_lea.vmem %s405_s1, 1024  ;;  %p2651_p7 = scmp.lt.s32.totalorder %s405_s1, %s405_s1 }
  0xbf   : > { %p2644_p0 = scmp.ne.s32.totalorder %s405_s1, %s2643_s14  ;;  %p2652_p9 = scmp.lt.s32.totalorder %s2643_s14, %s2643_s14 }
  0xc1   : > { %p2646_p2 = pnand %p2644_p0, %p2937_p8  ;;  %p2653_p4 = por %p2652_p9, %p2651_p7 }
  0xc3   : > { %p2647_p5 = pneg %p2646_p2 }
  0xc5   : > { %p2654_p10 = pnand %p2653_p4, %p2647_p5 }
  0xc7   : > { %2657 = shalt.err (!%p2654_p10)
}
  0xc8   : > { %2085 = dma.hbm_to_vmem [thread:$0]  (!%p2921_p6), %s3425_s8, 1024, %s405_s1, [#allocation16], %s3446_s11, %s3446_s11, %s3445_s13  }
  0xc9   : > { %s2658_s26 = scalar_lea.hbm %s3426_s9, 1024 }
  0xca   : > { %p2659_p1 = scmp.ne.s32.totalorder %s3426_s9, %s2658_s26  ;;  %p2665_p12 = scmp.lt.u32.totalorder %s2658_s26, %s3426_s9 }
  0xcc   : > { %p2661_p3 = pnand %p2659_p1, %p2937_p8 }
  0xce   : > { %p2662_p11 = pneg %p2661_p3 }
  0xd0   : > { %p2667_p13 = pnand %p2665_p12, %p2662_p11 }
  0xd2   : > { %2670 = shalt.err (!%p2667_p13)
}
  0xd3   : > { %s2671_s12 = scalar_lea.vmem %s418_s16, 1024  ;;  %p2679_p7 = scmp.lt.s32.totalorder %s418_s16, %s418_s16 }
  0xd4   : > { %p2672_p0 = scmp.ne.s32.totalorder %s418_s16, %s2671_s12  ;;  %p2680_p9 = scmp.lt.s32.totalorder %s2671_s12, %s2671_s12 }
  0xd6   : > { %p2674_p2 = pnand %p2672_p0, %p2937_p8  ;;  %p2681_p4 = por %p2680_p9, %p2679_p7 }
  0xd8   : > { %p2675_p5 = pneg %p2674_p2 }
  0xda   : > { %p2682_p10 = pnand %p2681_p4, %p2675_p5 }
  0xdc   : > { %2685 = shalt.err (!%p2682_p10)
}
  0xdd   : > { %2088 = dma.hbm_to_vmem [thread:$0]  (!%p2921_p6), %s3426_s9, 1024, %s418_s16, [#allocation19], %s3446_s11, %s3446_s11, %s3445_s13  }
  0xde   : > { %s1951_s28 = sadd.s32 4294967294, %s2802_s22   ;;  %s3137_s17 = sadd.s32 1, %s2802_s22  }
  0xdf   : > { %s41_s18 = sadd.s32 1, %s2798_s21  ;;  %s38_s30 = ssub.s32 %s2802_s22, %s3137_s17 }
  0xe0   : > { %p48_p8 = scmp.ne.s32.totalorder %s2798_s21, %s2794_s20  ;;  %p39_p1 = scmp.eq.s32.totalorder %s38_s30, 0 }
  0xe1   : > { %p49_p3 = scmp.eq.s32.totalorder %s2802_s22, 0  ;;  %p54_p11 = scmp.ne.s32.totalorder %s2794_s20, %s2790_s19 }
  0xe2   : > { %p288_p12 = scmp.eq.s32.totalorder %s2905_s24, 1  ;;  %p3447_p0 = scmp.eq.s32.totalorder %s2905_s24, 0 }
  0xe3   : > { %s3149_s29 = scalar_select %p39_p1, %s2798_s21, %s41_s18  }
  0xe4   : > { %p50_p13 = por %p49_p3, %p48_p8  ;;  %p3153_p2 = por %p3447_p0, %p54_p11 }
  0xe5   : > { %p3157_p6 = por %p288_p12, %p48_p8  ;;  %p294_p5 = scmp.eq.s32.totalorder %s1951_s28, 1 }
  0xe6   : > { %p2106_p7 = scmp.lt.s32.totalorder %s2802_s22, 2  ;;  %s434_s11 = sand.u32 1, %s2798_s21  }
  0xe7   : > { %s3449_s13 = scalar_select %p3157_p6, 1, 0 }
  0xe8   : > { %p3163_p9 = por %p294_p5, %p54_p11  ;;  %s1963_s26 = sshll.u32 %s434_s11, 2 }
  0xe9   : > { %s2019_s23 = sshll.u32 %s2802_s22, 6  ;;  %s438_s12 = scalar_lea.vmem [#allocation3], %s1963_s26 }
  0xea   : > { %s3450_s16 = scalar_select %p3163_p9, 1, 0 }
  0xeb   : > { %s3171_s15 = scalar_lea.hbm %s3417_s0, %s2019_s23  ;;  %s446_s1 = sshll.u32 %s438_s12, 4  ;;  %s3177_s1 = int_to_ptr.vmem [resolvable:$true] %s446_s1 }
  0xec   : > { %p3173_p4 = pnand %p2106_p7, %p50_p13  ;;  %s435_s28 = scalar_lea.sflag [#allocation4], %s434_s11 }
  0xed   : > { %s2686_s18 = scalar_lea.hbm %s3171_s15, 64  ;;  %s2691_s23 = scalar_lea.hbm %s3417_s0, 128 }
  0xee   : > { %p2687_p10 = scmp.ne.s32.totalorder %s3171_s15, %s2686_s18  ;;  %p2688_p8 = pneg %p3173_p4 }
  0xef   : > { %p2692_p11 = scmp.lt.u32.totalorder %s3171_s15, %s3417_s0  ;;  %p2693_p12 = scmp.lt.u32.totalorder %s2691_s23, %s2686_s18 }
  0xf0   : > { %p2689_p1 = pnand %p2688_p8, %p2687_p10  ;;  %p2695_p0 = scmp.lt.u32.totalorder %s2686_s18, %s3171_s15 }
  0xf1   : > { %p2694_p13 = por %p2693_p12, %p2692_p11 }
  0xf2   : > { %p2690_p3 = pneg %p2689_p1 }
  0xf3   : > { %p2696_p5 = por %p2695_p0, %p2694_p13 }
  0xf5   : > { %p2697_p7 = pnand %p2696_p5, %p2690_p3 }
  0xf7   : > { %2700 = shalt.err (!%p2697_p7)
}
  0xf8   : > { %s2701_s11 = scalar_lea.vmem %s3177_s1, 64  ;;  %s2817_s12 = smov [#allocation3]  }
  0xf9   : > { %p2702_p10 = scmp.ne.s32.totalorder %s3177_s1, %s2701_s11  ;;  %s2706_s30 = sshll.u32 %s2817_s12, 4  ;;  %s2707_s30 = int_to_ptr.vmem [resolvable:$false] %s2706_s30 }
  0xfa   : > { %s2708_s26 = scalar_lea.vmem %s2707_s30, 128  ;;  %p2709_p6 = scmp.lt.s32.totalorder %s3177_s1, %s2707_s30 }
  0xfb   : > { %p2704_p1 = pnand %p2702_p10, %p2688_p8  ;;  %p2710_p11 = scmp.lt.s32.totalorder %s2708_s26, %s2701_s11 }
  0xfd   : > { %p2705_p9 = pneg %p2704_p1  ;;  %p2711_p12 = por %p2710_p11, %p2709_p6 }
  0xff   : > { %p2712_p13 = pnand %p2711_p12, %p2705_p9 }
 0x101   : > { %2715 = shalt.err (!%p2712_p13)
}
 0x102   : > { %2092 = dma.hbm_to_vmem [thread:$0]  (!%p3173_p4), %s3171_s15, 64, %s3177_s1, %s435_s28  }
 0x103   : > { %s3452_s18 = sld [smem:[#allocation28_spill]] }
 0x109   : > { %p3453_p3 = scmp.ne.s32.totalorder %s3452_s18, 0 }
 0x10a   : > { %s3207_s23 = sand.u32 (!%p3453_p3), 1, %s2794_s20  }
 0x10b   : > { %455 = sbr.rel (%p3453_p3) target bundleno = 1296 (0x510), region = 64  ;;  %s1967_s25 = sshll.u32 (!%p3453_p3), %s3207_s23, 2 }
 0x10c   : > { %s458_s27 = scalar_lea.sflag (!%p3453_p3), [#allocation4], %s3207_s23  ;;  %s3213_s11 = scalar_lea.vmem (!%p3453_p3), [#allocation3], %s1967_s25 }
 0x112   : > { %2761 = dma.done.wait (%p3153_p2), %s458_s27, 64  }
 0x113   : > { %2763 = vsyncadd (%p3153_p2), %s458_s27, 4294967232  ;;  %p3454_p6 = scmp.eq.s32.totalorder %s2905_s24, 0 }
 0x115   : > { %2765 = dma.done.wait (%p3454_p6), [#allocation7], 2048   ;;  %p3455_p9 = pmov %p3454_p6 }
 0x116   : > { %p3456_p4 = pmov %p3454_p6 }
 0x117   : > { %2767 = vsyncadd (%p3455_p9), [#allocation7], 4294965248 }
 0x118   : > { %2769 = dma.done.wait (%p3456_p4), [#allocation10], 1536   ;;  %p3457_p8 = pmov %p3456_p4 }
 0x119   : > { %p3458_p0 = pmov %p3456_p4 }
 0x11a   : > { %2771 = vsyncadd (%p3457_p8), [#allocation10], 4294965760 }
 0x11b   : > { %2773 = dma.done.wait (%p3458_p0), [#allocation13], 1536   ;;  %p3459_p5 = pmov %p3458_p0 }
 0x11c   : > { %p3460_p2 = pmov %p3458_p0 }
 0x11d   : > { %2775 = vsyncadd (%p3459_p5), [#allocation13], 4294965760 }
 0x11e   : > { %2777 = dma.done.wait (%p3460_p2), [#allocation16], 1536   ;;  %p3461_p7 = pmov %p3458_p0 }
 0x11f   : > { %p3462_p10 = pmov %p3458_p0 }
 0x120   : > { %2779 = vsyncadd (%p3461_p7), [#allocation16], 4294965760 }
 0x121   : > { %2781 = dma.done.wait (%p3462_p10), [#allocation19], 1024   ;;  %p3463_p1 = pmov %p3458_p0 }
 0x122   : > { %v2818_v1 = vmov 0   ;;  %v641_v2 = vld [vmem:[#allocation8] sm:$0xff]  ;;  %v642_v4 = vld [vmem:[#allocation8 + $0x8] sm:$0xff]  ;;  %v543_v6 = vld [vmem:[#allocation6 + $0x18] sm:$0xff]  ;;  %v589_v51 = vlaneseq  ;;  %vm845_vm0 = vcmask 523264   ;;  %s2020_s10 = sshll.u32 %s2905_s24, 6 }
 0x123   : > { %2783 = vsyncadd (%p3463_p1), [#allocation19], 4294966272  ;;  %2165 = vset.pattern.permute.xlu1 %v2818_v1  ;;  %2164 = vset.pattern.permute.xlu0 %v2818_v1  ;;  %v540_v3 = vld [vmem:[#allocation6] sm:$0xff]  ;;  %v541_v5 = vld [vmem:[#allocation6 + $0x8] sm:$0xff]  ;;  %s535_s15 = scalar_lea.vmem [#allocation20], %s1967_s25  ;;  %s3464_s12 = sld [smem:[#allocation30_spill]] }
 0x124   : > { %890 = vmatprep.mubr.bf16.mxu0 %v2818_v1  ;;  %963 = vmatprep.mubr.bf16.mxu1 %v2818_v1  ;;  %v542_v7 = vld [vmem:[#allocation6 + $0x10] sm:$0xff]  ;;  %v644_v8 = vld [vmem:[#allocation8 + $0x18] sm:$0xff]  ;;  %v545_v10 = vld [vmem:[#allocation6 + $0x28] sm:$0xff]  ;;  %v3244_v52 = vshrl.u32 %v589_v51, 7  ;;  %s1795_s1 = sshll.u32 %s535_s15, 4  ;;  %vm1777_vm1 = vcmp.lt.s32.totalorder %v589_v51, 512  ;;  %s3375_s1 = int_to_ptr.vmem [resolvable:$true] %s1795_s1 }
 0x125   : > { %651 = vperm.xlu1 %2165, %v641_v2   ;;  %550 = vperm.xlu0 %2164, %v540_v3   ;;  %v643_v9 = vld [vmem:[#allocation8 + $0x10] sm:$0xff]  ;;  %v544_v11 = vld [vmem:[#allocation6 + $0x20] sm:$0xff]  ;;  %v646_v12 = vld [vmem:[#allocation8 + $0x28] sm:$0xff]  ;;  %s1781_s26 = scalar_lea.sflag [#allocation5], %s3207_s23  ;;  %s2716_s24 = scalar_lea.vmem %s3375_s1, 64 }
 0x126   : > { %v645_v13 = vld [vmem:[#allocation8 + $0x20] sm:$0xff]  ;;  %v547_v14 = vld [vmem:[#allocation6 + $0x38] sm:$0xff]  ;;  %v546_v15 = vld [vmem:[#allocation6 + $0x30] sm:$0xff]  ;;  %v591_v53 = vsub.s32 0, %v3244_v52  ;;  %v595_v54 = vsub.s32 1, %v3244_v52  ;;  %v599_v55 = vsub.s32 2, %v3244_v52  ;;  %p2717_p11 = scmp.ne.s32.totalorder %s3375_s1, %s2716_s24 }
 0x127   : > { %v648_v16 = vld [vmem:[#allocation8 + $0x38] sm:$0xff]  ;;  %v647_v17 = vld [vmem:[#allocation8 + $0x30] sm:$0xff]  ;;  %v778_v18 = vld [vmem:[#allocation11 + $0x8] sm:$0xff]  ;;  %v603_v56 = vsub.s32 3, %v3244_v52  ;;  %p3465_p12 = scmp.ne.s32.totalorder %s3449_s13, 0  ;;  %s2820_s18 = smov [#allocation20]  }
 0x128   : > { %v777_v19 = vld [vmem:[#allocation11] sm:$0xff]  ;;  %v780_v20 = vld [vmem:[#allocation11 + $0x18] sm:$0xff]  ;;  %v779_v21 = vld [vmem:[#allocation11 + $0x10] sm:$0xff]  ;;  %s2720_s25 = sshll.u32 %s2820_s18, 4  ;;  %s2721_s25 = int_to_ptr.vmem [resolvable:$false] %s2720_s25 }
 0x129   : > { %656 = vperm.xlu1 %2165, %v642_v4   ;;  %555 = vperm.xlu0 %2164, %v541_v5   ;;  %v782_v22 = vld [vmem:[#allocation11 + $0x28] sm:$0xff]  ;;  %v781_v23 = vld [vmem:[#allocation11 + $0x20] sm:$0xff]  ;;  %v784_v24 = vld [vmem:[#allocation11 + $0x38] sm:$0xff]  ;;  %s3373_s30 = scalar_lea.hbm %s3464_s12, %s2020_s10  ;;  %p2718_p13 = pnand %p2717_p11, %p3465_p12 }
 0x12a   : > { %v783_v25 = vld [vmem:[#allocation11 + $0x30] sm:$0xff]  ;;  %v1061_v26 = vld [vmem:[#allocation14 + $0x8] sm:$0xff]  ;;  %v1060_v27 = vld [vmem:[#allocation14] sm:$0xff]  ;;  %s2722_s27 = scalar_lea.vmem %s2721_s25, 128  ;;  %p2723_p6 = scmp.lt.s32.totalorder %s3375_s1, %s2721_s25 }
 0x12b   : > { %v1063_v28 = vld [vmem:[#allocation14 + $0x18] sm:$0xff]  ;;  %v1062_v29 = vld [vmem:[#allocation14 + $0x10] sm:$0xff]  ;;  %v1065_v30 = vld [vmem:[#allocation14 + $0x28] sm:$0xff]  ;;  %p2719_p3 = pneg %p2718_p13  ;;  %p2724_p9 = scmp.lt.s32.totalorder %s2722_s27, %s2716_s24 }
 0x12c   : > { %v1064_v31 = vld [vmem:[#allocation14 + $0x20] sm:$0xff]  ;;  %v1067_v32 = vld [vmem:[#allocation14 + $0x38] sm:$0xff]  ;;  %v1066_v33 = vld [vmem:[#allocation14 + $0x30] sm:$0xff] }
 0x12d   : > { %565 = vperm.xlu1 %2165, %v543_v6   ;;  %560 = vperm.xlu0 %2164, %v542_v7   ;;  %v1343_v34 = vld [vmem:[#allocation17 + $0x8] sm:$0xff]  ;;  %v1342_v35 = vld [vmem:[#allocation17] sm:$0xff]  ;;  %v1345_v36 = vld [vmem:[#allocation17 + $0x18] sm:$0xff]  ;;  %p2725_p4 = por %p2724_p9, %p2723_p6 }
 0x12e   : > { %v1344_v37 = vld [vmem:[#allocation17 + $0x10] sm:$0xff]  ;;  %v1347_v38 = vld [vmem:[#allocation17 + $0x28] sm:$0xff]  ;;  %v1346_v39 = vld [vmem:[#allocation17 + $0x20] sm:$0xff] }
 0x12f   : > { %v1349_v40 = vld [vmem:[#allocation17 + $0x38] sm:$0xff]  ;;  %v1348_v41 = vld [vmem:[#allocation17 + $0x30] sm:$0xff]  ;;  %v1601_v42 = vld [vmem:[#allocation18 + $0x8] sm:$0xff]  ;;  %p2726_p8 = pnand %p2725_p4, %p2719_p3 }
 0x130   : > { %v1600_v43 = vld [vmem:[#allocation18] sm:$0xff]  ;;  %v1603_v44 = vld [vmem:[#allocation18 + $0x18] sm:$0xff]  ;;  %v1602_v45 = vld [vmem:[#allocation18 + $0x10] sm:$0xff] }
 0x131   : > { %666 = vperm.xlu1 %2165, %v644_v8   ;;  %661 = vperm.xlu0 %2164, %v643_v9   ;;  %v1605_v46 = vld [vmem:[#allocation18 + $0x28] sm:$0xff]  ;;  %v1604_v47 = vld [vmem:[#allocation18 + $0x20] sm:$0xff]  ;;  %v1607_v48 = vld [vmem:[#allocation18 + $0x38] sm:$0xff] }
 0x132   : > { %v1606_v49 = vld [vmem:[#allocation18 + $0x30] sm:$0xff]  ;;  %v539_v57 = vld [vmem:[%s3213_s11] sm:$0xf] }
 0x133   : > { %v1732_v50 = vld [vmem:[#allocation2] sm:$0x1]  ;;  %v3253_v58 = vrot.slane %v539_v57, %v591_v53  ;;  %v3255_v59 = vrot.slane %v539_v57, %v595_v54  ;;  %v3257_v60 = vrot.slane %v539_v57, %v599_v55  ;;  %v3259_v61 = vrot.slane %v539_v57, %v603_v56 }
 0x135   : > { %575 = vperm.xlu1 %2165, %v545_v10   ;;  %570 = vperm.xlu0 %2164, %v544_v11  }
 0x139   : > { %676 = vperm.xlu1 %2165, %v646_v12   ;;  %671 = vperm.xlu0 %2164, %v645_v13  }
 0x13d   : > { %585 = vperm.xlu1 %2165, %v547_v14   ;;  %580 = vperm.xlu0 %2164, %v546_v15  }
 0x141   : > { %686 = vperm.xlu1 %2165, %v648_v16   ;;  %681 = vperm.xlu0 %2164, %v647_v17  }
 0x145   : > { %792 = vperm.xlu1 %2165, %v778_v18   ;;  %787 = vperm.xlu0 %2164, %v777_v19  }
 0x149   : > { %802 = vperm.xlu1 %2165, %v780_v20   ;;  %797 = vperm.xlu0 %2164, %v779_v21  }
 0x14d   : > { %812 = vperm.xlu1 %2165, %v782_v22   ;;  %807 = vperm.xlu0 %2164, %v781_v23  }
 0x151   : > { %822 = vperm.xlu1 %2165, %v784_v24   ;;  %817 = vperm.xlu0 %2164, %v783_v25  }
 0x155   : > { %1075 = vperm.xlu1 %2165, %v1061_v26   ;;  %1070 = vperm.xlu0 %2164, %v1060_v27  }
 0x159   : > { %1085 = vperm.xlu1 %2165, %v1063_v28   ;;  %1080 = vperm.xlu0 %2164, %v1062_v29  }
 0x15d   : > { %1095 = vperm.xlu1 %2165, %v1065_v30   ;;  %1090 = vperm.xlu0 %2164, %v1064_v31  }
 0x161   : > { %1105 = vperm.xlu1 %2165, %v1067_v32   ;;  %1100 = vperm.xlu0 %2164, %v1066_v33  }
 0x165   : > { %1357 = vperm.xlu1 %2165, %v1343_v34   ;;  %1352 = vperm.xlu0 %2164, %v1342_v35  }
 0x169   : > { %1367 = vperm.xlu1 %2165, %v1345_v36   ;;  %1362 = vperm.xlu0 %2164, %v1344_v37  }
 0x16d   : > { %1377 = vperm.xlu1 %2165, %v1347_v38   ;;  %1372 = vperm.xlu0 %2164, %v1346_v39  }
 0x171   : > { %1387 = vperm.xlu1 %2165, %v1349_v40   ;;  %1382 = vperm.xlu0 %2164, %v1348_v41  }
 0x175   : > { %1615 = vperm.xlu1 %2165, %v1601_v42   ;;  %1610 = vperm.xlu0 %2164, %v1600_v43  }
 0x179   : > { %1625 = vperm.xlu1 %2165, %v1603_v44   ;;  %1620 = vperm.xlu0 %2164, %v1602_v45  }
 0x17d   : > { %1635 = vperm.xlu1 %2165, %v1605_v46   ;;  %1630 = vperm.xlu0 %2164, %v1604_v47  }
 0x181   : > { %1645 = vperm.xlu1 %2165, %v1607_v48   ;;  %1640 = vperm.xlu0 %2164, %v1606_v49  }
 0x185   : > { %1735 = vperm.xlu0 %2164, %v1732_v50  }
 0x1a4   : > { %v652_v62 = vpop.permute.xlu1 %651  ;;  %v551_v63 = vpop.permute.xlu0 %550 }
 0x1a5   : > { %v609_v0 = vmul.f32 %v3253_v58, %v551_v63  ;;  %v610_v2 = vmul.f32 %v3255_v59, %v551_v63  ;;  %v611_v3 = vmul.f32 %v3257_v60, %v551_v63  ;;  %v612_v4 = vmul.f32 %v3259_v61, %v551_v63 }
 0x1a7   : > { %v689_v5 = vadd.f32 %v652_v62, %v609_v0  ;;  %v690_v6 = vadd.f32 %v652_v62, %v610_v2  ;;  %v691_v7 = vadd.f32 %v652_v62, %v611_v3  ;;  %v692_v8 = vadd.f32 %v652_v62, %v612_v4 }
 0x1a8   : > { %v657_v9 = vpop.permute.xlu1 %656  ;;  %v556_v10 = vpop.permute.xlu0 %555 }
 0x1a9   : > { %2178 = vtanh.f32 %v689_v5  ;;  %v613_v11 = vmul.f32 %v3253_v58, %v556_v10  ;;  %v614_v12 = vmul.f32 %v3255_v59, %v556_v10  ;;  %v615_v13 = vmul.f32 %v3257_v60, %v556_v10 }
 0x1aa   : > { %2180 = vtanh.f32 %v690_v6  ;;  %v616_v14 = vmul.f32 %v3259_v61, %v556_v10 }
 0x1ab   : > { %2182 = vtanh.f32 %v691_v7  ;;  %v693_v15 = vadd.f32 %v657_v9, %v613_v11  ;;  %v694_v16 = vadd.f32 %v657_v9, %v614_v12  ;;  %v695_v17 = vadd.f32 %v657_v9, %v615_v13 }
 0x1ac   : > { %2184 = vtanh.f32 %v692_v8  ;;  %v696_v18 = vadd.f32 %v657_v9, %v616_v14  ;;  %v566_v19 = vpop.permute.xlu1 %565  ;;  %v561_v20 = vpop.permute.xlu0 %560 }
 0x1ad   : > { %2186 = vtanh.f32 %v693_v15  ;;  %v621_v21 = vmul.f32 %v3253_v58, %v566_v19  ;;  %v622_v22 = vmul.f32 %v3255_v59, %v566_v19  ;;  %v623_v23 = vmul.f32 %v3257_v60, %v566_v19 }
 0x1ae   : > { %2188 = vtanh.f32 %v694_v16  ;;  %v624_v24 = vmul.f32 %v3259_v61, %v566_v19  ;;  %v617_v27 = vmul.f32 %v3253_v58, %v561_v20  ;;  %v618_v31 = vmul.f32 %v3255_v59, %v561_v20 }
 0x1af   : > { %2190 = vtanh.f32 %v695_v17  ;;  %v619_v34 = vmul.f32 %v3257_v60, %v561_v20  ;;  %v620_v37 = vmul.f32 %v3259_v61, %v561_v20 }
 0x1b0   : > { %2192 = vtanh.f32 %v696_v18  ;;  %v667_v25 = vpop.permute.xlu1 %666  ;;  %v662_v26 = vpop.permute.xlu0 %661 }
 0x1b1   : > { %v701_v28 = vadd.f32 %v667_v25, %v621_v21  ;;  %v702_v29 = vadd.f32 %v667_v25, %v622_v22  ;;  %v703_v30 = vadd.f32 %v667_v25, %v623_v23  ;;  %v704_v32 = vadd.f32 %v667_v25, %v624_v24 }
 0x1b2   : > { %v697_v35 = vadd.f32 %v662_v26, %v617_v27  ;;  %v698_v38 = vadd.f32 %v662_v26, %v618_v31  ;;  %v699_v42 = vadd.f32 %v662_v26, %v619_v34  ;;  %v700_v44 = vadd.f32 %v662_v26, %v620_v37 }
 0x1b3   : > { %v2179_v33 = vpop.eup %2178  ;;  %2194 = vtanh.f32 %v701_v28 }
 0x1b4   : > { %v2181_v36 = vpop.eup %2180  ;;  %2196 = vtanh.f32 %v702_v29  ;;  %v576_v39 = vpop.permute.xlu1 %575 }
 0x1b5   : > { %v571_v40 = vpop.permute.xlu0 %570  ;;  %v2183_v41 = vpop.eup %2182  ;;  %2198 = vtanh.f32 %v703_v30  ;;  %v629_v46 = vmul.f32 %v3253_v58, %v576_v39  ;;  %v630_v47 = vmul.f32 %v3255_v59, %v576_v39  ;;  %v631_v48 = vmul.f32 %v3257_v60, %v576_v39 }
 0x1b6   : > { %v2185_v43 = vpop.eup %2184  ;;  %2200 = vtanh.f32 %v704_v32  ;;  %v632_v50 = vmul.f32 %v3259_v61, %v576_v39  ;;  %v625_v54 = vmul.f32 %v3253_v58, %v571_v40  ;;  %v626_v55 = vmul.f32 %v3255_v59, %v571_v40 }
 0x1b7   : > { %v2187_v45 = vpop.eup %2186  ;;  %2202 = vtanh.f32 %v697_v35  ;;  %v627_v4 = vmul.f32 %v3257_v60, %v571_v40  ;;  %v628_v7 = vmul.f32 %v3259_v61, %v571_v40 }
 0x1b8   : > { %v2189_v49 = vpop.eup %2188  ;;  %2204 = vtanh.f32 %v698_v38  ;;  %v677_v56 = vpop.permute.xlu1 %676  ;;  %v761_v6 = vpack.c.bf16 %v2187_v45, %v2179_v33 }
 0x1b9   : > { %v672_v57 = vpop.permute.xlu0 %671  ;;  %v2191_v62 = vpop.eup %2190  ;;  %2206 = vtanh.f32 %v699_v42  ;;  %v709_v63 = vadd.f32 %v677_v56, %v629_v46  ;;  %v710_v0 = vadd.f32 %v677_v56, %v630_v47  ;;  %v711_v2 = vadd.f32 %v677_v56, %v631_v48 }
 0x1ba   : > { %v2193_v3 = vpop.eup %2192  ;;  %2208 = vtanh.f32 %v700_v44  ;;  %v712_v5 = vadd.f32 %v677_v56, %v632_v50  ;;  %v705_v8 = vadd.f32 %v672_v57, %v625_v54  ;;  %v762_v9 = vpack.c.bf16 %v2189_v49, %v2181_v36 }
 0x1bb   : > { %2210 = vtanh.f32 %v709_v63  ;;  %v706_v10 = vadd.f32 %v672_v57, %v626_v55  ;;  %v764_v11 = vpack.c.bf16 %v2193_v3, %v2185_v43  ;;  %v763_v12 = vpack.c.bf16 %v2191_v62, %v2183_v41 }
 0x1bc   : > { %2212 = vtanh.f32 %v710_v0  ;;  %v586_v13 = vpop.permute.xlu1 %585  ;;  %v707_v16 = vadd.f32 %v672_v57, %v627_v4  ;;  %858 = vmatprep.subr.bf16.mxu0 %v762_v9  ;;  %v708_v18 = vadd.f32 %v672_v57, %v628_v7 }
 0x1bd   : > { %v581_v14 = vpop.permute.xlu0 %580  ;;  %v2195_v15 = vpop.eup %2194  ;;  %2214 = vtanh.f32 %v711_v2  ;;  %931 = vmatprep.subr.bf16.mxu1 %v764_v11  ;;  %859 = vmatpush1.bf16.msra.mxu0 %v761_v6  ;;  %v637_v20 = vmul.f32 %v3253_v58, %v586_v13  ;;  %v638_v21 = vmul.f32 %v3255_v59, %v586_v13  ;;  %v639_v22 = vmul.f32 %v3257_v60, %v586_v13  ;;  %v2166_v11 = vld [vmem:[#allocation9] sm:$0xff]  }
 0x1be   : > { %v2197_v17 = vpop.eup %2196  ;;  %2216 = vtanh.f32 %v712_v5  ;;  %932 = vmatpush1.bf16.msra.mxu1 %v763_v12  ;;  %v640_v24 = vmul.f32 %v3259_v61, %v586_v13  ;;  %v633_v25 = vmul.f32 %v3253_v58, %v581_v14  ;;  %v634_v33 = vmul.f32 %v3255_v59, %v581_v14  ;;  %v2167_v12 = vld [vmem:[#allocation9 + $0x8] sm:$0xff]   ;;  %v2168_v13 = vld [vmem:[#allocation9 + $0x10] sm:$0xff]  }
 0x1bf   : > { %v2199_v19 = vpop.eup %2198  ;;  %2218 = vtanh.f32 %v705_v8  ;;  %v635_v34 = vmul.f32 %v3257_v60, %v581_v14  ;;  %v636_v37 = vmul.f32 %v3259_v61, %v581_v14  ;;  %v2169_v14 = vld [vmem:[#allocation9 + $0x18] sm:$0xff]  }
 0x1c0   : > { %v2201_v23 = vpop.eup %2200  ;;  %2220 = vtanh.f32 %v706_v10  ;;  %v687_v26 = vpop.permute.xlu1 %686 }
 0x1c1   : > { %v682_v27 = vpop.permute.xlu0 %681  ;;  %v2203_v28 = vpop.eup %2202  ;;  %2222 = vtanh.f32 %v707_v16  ;;  %v717_v29 = vadd.f32 %v687_v26, %v637_v20  ;;  %v718_v30 = vadd.f32 %v687_v26, %v638_v21  ;;  %v719_v31 = vadd.f32 %v687_v26, %v639_v22 }
 0x1c2   : > { %v2205_v32 = vpop.eup %2204  ;;  %2224 = vtanh.f32 %v708_v18  ;;  %v720_v35 = vadd.f32 %v687_v26, %v640_v24  ;;  %v713_v38 = vadd.f32 %v682_v27, %v633_v25  ;;  %v714_v40 = vadd.f32 %v682_v27, %v634_v33 }
 0x1c3   : > { %v2207_v36 = vpop.eup %2206  ;;  %2226 = vtanh.f32 %v717_v29  ;;  %v766_v58 = vpack.c.bf16 %v2197_v17, %v2205_v32  ;;  %v765_v41 = vpack.c.bf16 %v2195_v15, %v2203_v28  ;;  %v715_v44 = vadd.f32 %v682_v27, %v635_v34 }
 0x1c4   : > { %v2209_v39 = vpop.eup %2208  ;;  %2228 = vtanh.f32 %v718_v30  ;;  %v767_v42 = vpack.c.bf16 %v2199_v19, %v2207_v36  ;;  %v716_v60 = vadd.f32 %v682_v27, %v636_v37  ;;  %v793_v17 = vpop.permute.xlu1 %792 }
 0x1c5   : > { %v2211_v43 = vpop.eup %2210  ;;  %2230 = vtanh.f32 %v719_v31  ;;  %860 = vmatprep.subr.bf16.mxu0 %v766_v58  ;;  %v768_v45 = vpack.c.bf16 %v2201_v23, %v2209_v39  ;;  %v788_v15 = vpop.permute.xlu0 %787 }
 0x1c6   : > { %v2213_v59 = vpop.eup %2212  ;;  %2232 = vtanh.f32 %v720_v35  ;;  %861 = vmatpush1.bf16.msra.mxu0 %v765_v41 }
 0x1c7   : > { %v2215_v46 = vpop.eup %2214  ;;  %2234 = vtanh.f32 %v713_v38  ;;  %933 = vmatprep.subr.bf16.mxu1 %v768_v45 }
 0x1c8   : > { %v2217_v61 = vpop.eup %2216  ;;  %2236 = vtanh.f32 %v714_v40  ;;  %934 = vmatpush1.bf16.msra.mxu1 %v767_v42  ;;  %v803_v35 = vpop.permute.xlu1 %802 }
 0x1c9   : > { %v2219_v47 = vpop.eup %2218  ;;  %2238 = vtanh.f32 %v715_v44  ;;  %v798_v33 = vpop.permute.xlu0 %797 }
 0x1ca   : > { %v2221_v48 = vpop.eup %2220  ;;  %2240 = vtanh.f32 %v716_v60  ;;  %v769_v49 = vpack.c.bf16 %v2211_v43, %v2219_v47 }
 0x1cb   : > { %v2223_v50 = vpop.eup %2222  ;;  %v770_v54 = vpack.c.bf16 %v2213_v59, %v2221_v48 }
 0x1cc   : > { %v2225_v55 = vpop.eup %2224  ;;  %v771_v56 = vpack.c.bf16 %v2215_v46, %v2223_v50 }
 0x1cd   : > { %v2227_v57 = vpop.eup %2226  ;;  %862 = vmatprep.subr.bf16.mxu0 %v770_v54  ;;  %v772_v62 = vpack.c.bf16 %v2217_v61, %v2225_v55  ;;  %v808_v54 = vpop.permute.xlu0 %807 }
 0x1ce   : > { %v2229_v63 = vpop.eup %2228  ;;  %863 = vmatpush1.bf16.msra.mxu0 %v769_v49 }
 0x1cf   : > { %v2231_v0 = vpop.eup %2230  ;;  %935 = vmatprep.subr.bf16.mxu1 %v772_v62 }
 0x1d0   : > { %v2233_v2 = vpop.eup %2232  ;;  %936 = vmatpush1.bf16.msra.mxu1 %v771_v56 }
 0x1d1   : > { %v2235_v3 = vpop.eup %2234 }
 0x1d2   : > { %v2237_v4 = vpop.eup %2236  ;;  %v773_v5 = vpack.c.bf16 %v2227_v57, %v2235_v3  ;;  %v813_v57 = vpop.permute.xlu1 %812 }
 0x1d3   : > { %v2239_v6 = vpop.eup %2238  ;;  %v774_v7 = vpack.c.bf16 %v2229_v63, %v2237_v4 }
 0x1d4   : > { %v2241_v8 = vpop.eup %2240  ;;  %v775_v9 = vpack.c.bf16 %v2231_v0, %v2239_v6 }
 0x1d5   : > { %864 = vmatprep.subr.bf16.mxu0 %v774_v7  ;;  %v776_v10 = vpack.c.bf16 %v2233_v2, %v2241_v8 }
 0x1d6   : > { %865 = vmatpush1.bf16.msra.mxu0 %v773_v5 }
 0x1d7   : > { %937 = vmatprep.subr.bf16.mxu1 %v776_v10 }
 0x1d8   : > { %938 = vmatpush1.bf16.msra.mxu1 %v775_v9 }
 0x1d9   : > { %1982 = vmatmul.mubr.msk.bf16.vlgmr.msra.gmra.mrb[0].mxu0 %vm845_vm0, %v2166_v11 }
 0x1da   : > { %900 = vmatprep.mubr.bf16.mxu0 %v2818_v1 }
 0x1db   : > { %1986 = vmatmul.mubr.msk.bf16.vlgmr.msra.gmra.mrb[0].mxu1 %vm845_vm0, %v2166_v11 }
 0x1dc   : > { %973 = vmatprep.mubr.bf16.mxu1 %v2818_v1 }
 0x1e1   : > { %1983 = vmatmul.mubr.msk.bf16.gmra.mrb[4].mxu0 %vm845_vm0, %v2167_v12 }
 0x1e2   : > { %910 = vmatprep.mubr.bf16.mxu0 %v2818_v1 }
 0x1e3   : > { %1987 = vmatmul.mubr.msk.bf16.gmra.mrb[4].mxu1 %vm845_vm0, %v2167_v12 }
 0x1e4   : > { %983 = vmatprep.mubr.bf16.mxu1 %v2818_v1 }
 0x1e9   : > { %1984 = vmatmul.mubr.msk.bf16.gmra.mrb[8].mxu0 %vm845_vm0, %v2168_v13 }
 0x1ea   : > { %920 = vmatprep.mubr.bf16.mxu0 %v2818_v1 }
 0x1eb   : > { %1988 = vmatmul.mubr.msk.bf16.gmra.mrb[8].mxu1 %vm845_vm0, %v2168_v13 }
 0x1ec   : > { %993 = vmatprep.mubr.bf16.mxu1 %v2818_v1 }
 0x1f1   : > { %1985 = vmatmul.mubr.msk.bf16.gmra.mrb[12].mxu0 %vm845_vm0, %v2169_v14 }
 0x1f2   : > { %1172 = vmatprep.mubr.bf16.mxu0 %v2818_v1 }
 0x1f3   : > { %1989 = vmatmul.mubr.msk.bf16.gmra.mrb[12].mxu1 %vm845_vm0, %v2169_v14 }
 0x1f4   : > { %1245 = vmatprep.mubr.bf16.mxu1 %v2818_v1 }
 0x2ac   : > { %v892_v16 = vpop.f32.mrb[0].mxu0 }
 0x2ad   : > { %v893_v18 = vadd.f32 %v892_v16, %v788_v15  ;;  %v894_v19 = vpop.f32.mrb[1].mxu0 }
 0x2ae   : > { %v965_v20 = vpop.f32.mrb[0].mxu1  ;;  %v895_v21 = vadd.f32 %v894_v19, %v788_v15  ;;  %v896_v22 = vpop.f32.mrb[2].mxu0 }
 0x2af   : > { %2242 = vtanh.f32 %v893_v18  ;;  %v966_v23 = vadd.f32 %v965_v20, %v788_v15  ;;  %v967_v24 = vpop.f32.mrb[1].mxu1  ;;  %v897_v25 = vadd.f32 %v896_v22, %v793_v17  ;;  %v898_v26 = vpop.f32.mrb[3].mxu0 }
 0x2b0   : > { %2244 = vtanh.f32 %v895_v21  ;;  %v968_v27 = vadd.f32 %v967_v24, %v788_v15  ;;  %v969_v28 = vpop.f32.mrb[2].mxu1  ;;  %v899_v30 = vadd.f32 %v898_v26, %v793_v17 }
 0x2b1   : > { %2246 = vtanh.f32 %v966_v23  ;;  %v970_v29 = vadd.f32 %v969_v28, %v793_v17  ;;  %v971_v31 = vpop.f32.mrb[3].mxu1  ;;  %v823_v28 = vpop.permute.xlu1 %822 }
 0x2b2   : > { %2248 = vtanh.f32 %v968_v27  ;;  %v972_v32 = vadd.f32 %v971_v31, %v793_v17 }
 0x2b3   : > { %2250 = vtanh.f32 %v897_v25  ;;  %v818_v25 = vpop.permute.xlu0 %817 }
 0x2b4   : > { %2252 = vtanh.f32 %v970_v29  ;;  %v902_v34 = vpop.f32.mrb[4].mxu0 }
 0x2b5   : > { %2254 = vtanh.f32 %v899_v30  ;;  %v903_v36 = vadd.f32 %v902_v34, %v798_v33  ;;  %v904_v37 = vpop.f32.mrb[5].mxu0 }
 0x2b6   : > { %2256 = vtanh.f32 %v972_v32  ;;  %v975_v38 = vpop.f32.mrb[4].mxu1  ;;  %v905_v58 = vadd.f32 %v904_v37, %v798_v33  ;;  %v906_v39 = vpop.f32.mrb[6].mxu0 }
 0x2b7   : > { %2258 = vtanh.f32 %v903_v36  ;;  %v976_v40 = vadd.f32 %v975_v38, %v798_v33  ;;  %v977_v41 = vpop.f32.mrb[5].mxu1  ;;  %v907_v42 = vadd.f32 %v906_v39, %v803_v35  ;;  %v908_v43 = vpop.f32.mrb[7].mxu0 }
 0x2b8   : > { %2260 = vtanh.f32 %v905_v58  ;;  %v978_v44 = vadd.f32 %v977_v41, %v798_v33  ;;  %v979_v45 = vpop.f32.mrb[6].mxu1  ;;  %v909_v46 = vadd.f32 %v908_v43, %v803_v35 }
 0x2b9   : > { %v2243_v59 = vpop.eup %2242  ;;  %2262 = vtanh.f32 %v976_v40  ;;  %v980_v60 = vadd.f32 %v979_v45, %v803_v35  ;;  %v981_v61 = vpop.f32.mrb[7].mxu1 }
 0x2ba   : > { %v2245_v47 = vpop.eup %2244  ;;  %2264 = vtanh.f32 %v978_v44  ;;  %v982_v48 = vadd.f32 %v981_v61, %v803_v35 }
 0x2bb   : > { %v2247_v49 = vpop.eup %2246  ;;  %2266 = vtanh.f32 %v907_v42 }
 0x2bc   : > { %v2249_v50 = vpop.eup %2248  ;;  %2268 = vtanh.f32 %v980_v60  ;;  %v912_v55 = vpop.f32.mrb[8].mxu0 }
 0x2bd   : > { %v2251_v56 = vpop.eup %2250  ;;  %2270 = vtanh.f32 %v909_v46  ;;  %v913_v62 = vadd.f32 %v912_v55, %v808_v54  ;;  %v914_v63 = vpop.f32.mrb[9].mxu0 }
 0x2be   : > { %v2253_v0 = vpop.eup %2252  ;;  %2272 = vtanh.f32 %v982_v48  ;;  %v985_v2 = vpop.f32.mrb[8].mxu1  ;;  %v915_v3 = vadd.f32 %v914_v63, %v808_v54  ;;  %v1044_v5 = vpack.c.bf16 %v2251_v56, %v2243_v59 }
 0x2bf   : > { %v916_v4 = vpop.f32.mrb[10].mxu0  ;;  %v2255_v6 = vpop.eup %2254  ;;  %2274 = vtanh.f32 %v913_v62  ;;  %v986_v7 = vadd.f32 %v985_v2, %v808_v54  ;;  %v1046_v11 = vpack.c.bf16 %v2253_v0, %v2247_v49 }
 0x2c0   : > { %v987_v8 = vpop.f32.mrb[9].mxu1  ;;  %v917_v9 = vadd.f32 %v916_v4, %v813_v57  ;;  %v918_v10 = vpop.f32.mrb[11].mxu0  ;;  %2276 = vtanh.f32 %v915_v3  ;;  %v1045_v15 = vpack.c.bf16 %v2255_v6, %v2245_v47 }
 0x2c1   : > { %v2257_v12 = vpop.eup %2256  ;;  %v988_v13 = vadd.f32 %v987_v8, %v808_v54  ;;  %v989_v14 = vpop.f32.mrb[10].mxu1  ;;  %2278 = vtanh.f32 %v986_v7  ;;  %v919_v18 = vadd.f32 %v918_v10, %v813_v57 }
 0x2c2   : > { %v2259_v16 = vpop.eup %2258  ;;  %v990_v17 = vadd.f32 %v989_v14, %v813_v57  ;;  %v991_v19 = vpop.f32.mrb[11].mxu1  ;;  %v1047_v20 = vpack.c.bf16 %v2257_v12, %v2249_v50  ;;  %1140 = vmatprep.subr.bf16.mxu0 %v1045_v15  ;;  %v2170_v15 = vld [vmem:[#allocation12] sm:$0xff]  }
 0x2c3   : > { %v2261_v21 = vpop.eup %2260  ;;  %2280 = vtanh.f32 %v988_v13  ;;  %v992_v22 = vadd.f32 %v991_v19, %v813_v57  ;;  %1141 = vmatpush1.bf16.msra.mxu0 %v1044_v5  ;;  %v1076_v19 = vpop.permute.xlu1 %1075 }
 0x2c4   : > { %v2263_v23 = vpop.eup %2262  ;;  %2282 = vtanh.f32 %v917_v9  ;;  %1213 = vmatprep.subr.bf16.mxu1 %v1047_v20  ;;  %v922_v26 = vpop.f32.mrb[12].mxu0 }
 0x2c5   : > { %v2265_v24 = vpop.eup %2264  ;;  %2284 = vtanh.f32 %v990_v17  ;;  %1214 = vmatpush1.bf16.msra.mxu1 %v1046_v11  ;;  %v923_v29 = vadd.f32 %v922_v26, %v818_v25  ;;  %v924_v30 = vpop.f32.mrb[13].mxu0  ;;  %v2172_v17 = vld [vmem:[#allocation12 + $0x10] sm:$0xff]  }
 0x2c6   : > { %v2267_v27 = vpop.eup %2266  ;;  %2286 = vtanh.f32 %v919_v18  ;;  %v995_v32 = vpop.f32.mrb[12].mxu1  ;;  %v925_v33 = vadd.f32 %v924_v30, %v818_v25  ;;  %v2173_v18 = vld [vmem:[#allocation12 + $0x18] sm:$0xff]  }
 0x2c7   : > { %v2269_v31 = vpop.eup %2268  ;;  %2288 = vtanh.f32 %v992_v22  ;;  %v926_v34 = vpop.f32.mrb[14].mxu0  ;;  %v1048_v35 = vpack.c.bf16 %v2267_v27, %v2259_v16  ;;  %v996_v37 = vadd.f32 %v995_v32, %v818_v25  ;;  %v2171_v16 = vld [vmem:[#allocation12 + $0x8] sm:$0xff]  }
 0x2c8   : > { %v2271_v36 = vpop.eup %2270  ;;  %2290 = vtanh.f32 %v923_v29  ;;  %v997_v38 = vpop.f32.mrb[13].mxu1  ;;  %v927_v58 = vadd.f32 %v926_v34, %v823_v28  ;;  %v1050_v40 = vpack.c.bf16 %v2269_v31, %v2263_v23 }
 0x2c9   : > { %v928_v39 = vpop.f32.mrb[15].mxu0  ;;  %v2273_v41 = vpop.eup %2272  ;;  %2292 = vtanh.f32 %v925_v33  ;;  %v998_v42 = vadd.f32 %v997_v38, %v818_v25  ;;  %v1049_v44 = vpack.c.bf16 %v2271_v36, %v2261_v21 }
 0x2ca   : > { %v999_v43 = vpop.f32.mrb[14].mxu1  ;;  %v2275_v45 = vpop.eup %2274  ;;  %2294 = vtanh.f32 %v996_v37  ;;  %v929_v60 = vadd.f32 %v928_v39, %v823_v28  ;;  %v1051_v61 = vpack.c.bf16 %v2273_v41, %v2265_v24 }
 0x2cb   : > { %v1000_v59 = vadd.f32 %v999_v43, %v823_v28  ;;  %v1001_v46 = vpop.f32.mrb[15].mxu1  ;;  %v2277_v47 = vpop.eup %2276  ;;  %2296 = vtanh.f32 %v998_v42  ;;  %1142 = vmatprep.subr.bf16.mxu0 %v1049_v44 }
 0x2cc   : > { %v1002_v48 = vadd.f32 %v1001_v46, %v823_v28  ;;  %v2279_v49 = vpop.eup %2278  ;;  %2298 = vtanh.f32 %v927_v58  ;;  %1215 = vmatprep.subr.bf16.mxu1 %v1051_v61  ;;  %1143 = vmatpush1.bf16.msra.mxu0 %v1048_v35  ;;  %v1071_v20 = vpop.permute.xlu0 %1070 }
 0x2cd   : > { %v2281_v50 = vpop.eup %2280  ;;  %2300 = vtanh.f32 %v1000_v59  ;;  %1216 = vmatpush1.bf16.msra.mxu1 %v1050_v40  ;;  %v1086_v37 = vpop.permute.xlu1 %1085 }
 0x2ce   : > { %v2283_v54 = vpop.eup %2282  ;;  %2302 = vtanh.f32 %v929_v60 }
 0x2cf   : > { %v2285_v55 = vpop.eup %2284  ;;  %2304 = vtanh.f32 %v1002_v48  ;;  %v1052_v56 = vpack.c.bf16 %v2283_v54, %v2275_v45 }
 0x2d0   : > { %v2287_v57 = vpop.eup %2286  ;;  %v1054_v62 = vpack.c.bf16 %v2285_v55, %v2279_v49  ;;  %v1081_v38 = vpop.permute.xlu0 %1080 }
 0x2d1   : > { %v2289_v63 = vpop.eup %2288  ;;  %v1053_v0 = vpack.c.bf16 %v2287_v57, %v2277_v47  ;;  %v1096_v57 = vpop.permute.xlu1 %1095 }
 0x2d2   : > { %v2291_v2 = vpop.eup %2290  ;;  %v1055_v3 = vpack.c.bf16 %v2289_v63, %v2281_v50 }
 0x2d3   : > { %v2293_v4 = vpop.eup %2292  ;;  %1144 = vmatprep.subr.bf16.mxu0 %v1053_v0 }
 0x2d4   : > { %v2295_v5 = vpop.eup %2294  ;;  %1217 = vmatprep.subr.bf16.mxu1 %v1055_v3  ;;  %1145 = vmatpush1.bf16.msra.mxu0 %v1052_v56  ;;  %v1091_v63 = vpop.permute.xlu0 %1090 }
 0x2d5   : > { %v2297_v6 = vpop.eup %2296  ;;  %1218 = vmatpush1.bf16.msra.mxu1 %v1054_v62 }
 0x2d6   : > { %v2299_v7 = vpop.eup %2298 }
 0x2d7   : > { %v2301_v8 = vpop.eup %2300  ;;  %v1056_v9 = vpack.c.bf16 %v2299_v7, %v2291_v2 }
 0x2d8   : > { %v2303_v10 = vpop.eup %2302  ;;  %v1058_v11 = vpack.c.bf16 %v2301_v8, %v2295_v5 }
 0x2d9   : > { %v2305_v12 = vpop.eup %2304  ;;  %v1057_v13 = vpack.c.bf16 %v2303_v10, %v2293_v4 }
 0x2da   : > { %v1059_v14 = vpack.c.bf16 %v2305_v12, %v2297_v6 }
 0x2db   : > { %1146 = vmatprep.subr.bf16.mxu0 %v1057_v13 }
 0x2dc   : > { %1219 = vmatprep.subr.bf16.mxu1 %v1059_v14  ;;  %1147 = vmatpush1.bf16.msra.mxu0 %v1056_v9 }
 0x2dd   : > { %1220 = vmatpush1.bf16.msra.mxu1 %v1058_v11 }
 0x2df   : > { %1994 = vmatmul.mubr.msk.bf16.vlgmr.msra.gmra.mrb[16].mxu0 %vm845_vm0, %v2170_v15 }
 0x2e0   : > { %1998 = vmatmul.mubr.msk.bf16.vlgmr.msra.gmra.mrb[16].mxu1 %vm845_vm0, %v2170_v15  ;;  %1182 = vmatprep.mubr.bf16.mxu0 %v2818_v1 }
 0x2e1   : > { %1255 = vmatprep.mubr.bf16.mxu1 %v2818_v1 }
 0x2e7   : > { %1995 = vmatmul.mubr.msk.bf16.gmra.mrb[20].mxu0 %vm845_vm0, %v2171_v16 }
 0x2e8   : > { %1999 = vmatmul.mubr.msk.bf16.gmra.mrb[20].mxu1 %vm845_vm0, %v2171_v16  ;;  %1192 = vmatprep.mubr.bf16.mxu0 %v2818_v1 }
 0x2e9   : > { %1265 = vmatprep.mubr.bf16.mxu1 %v2818_v1 }
 0x2ef   : > { %1996 = vmatmul.mubr.msk.bf16.gmra.mrb[24].mxu0 %vm845_vm0, %v2172_v17 }
 0x2f0   : > { %2000 = vmatmul.mubr.msk.bf16.gmra.mrb[24].mxu1 %vm845_vm0, %v2172_v17  ;;  %1202 = vmatprep.mubr.bf16.mxu0 %v2818_v1 }
 0x2f1   : > { %1275 = vmatprep.mubr.bf16.mxu1 %v2818_v1 }
 0x2f7   : > { %1997 = vmatmul.mubr.msk.bf16.gmra.mrb[28].mxu0 %vm845_vm0, %v2173_v18 }
 0x2f8   : > { %2001 = vmatmul.mubr.msk.bf16.gmra.mrb[28].mxu1 %vm845_vm0, %v2173_v18  ;;  %1454 = vmatprep.mubr.bf16.mxu0 %v2818_v1 }
 0x2f9   : > { %1527 = vmatprep.mubr.bf16.mxu1 %v2818_v1 }
 0x3b2   : > { %v1174_v21 = vpop.f32.mrb[16].mxu0 }
 0x3b3   : > { %v1175_v22 = vadd.f32 %v1174_v21, %v1071_v20  ;;  %v1247_v23 = vpop.f32.mrb[16].mxu1  ;;  %v1176_v24 = vpop.f32.mrb[17].mxu0 }
 0x3b4   : > { %v1248_v25 = vadd.f32 %v1247_v23, %v1071_v20  ;;  %v1177_v26 = vadd.f32 %v1176_v24, %v1071_v20  ;;  %v1249_v27 = vpop.f32.mrb[17].mxu1  ;;  %v1178_v28 = vpop.f32.mrb[18].mxu0 }
 0x3b5   : > { %2306 = vtanh.f32 %v1175_v22  ;;  %v1250_v29 = vadd.f32 %v1249_v27, %v1071_v20  ;;  %v1179_v30 = vadd.f32 %v1178_v28, %v1076_v19  ;;  %v1251_v31 = vpop.f32.mrb[18].mxu1  ;;  %v1180_v32 = vpop.f32.mrb[19].mxu0 }
 0x3b6   : > { %2308 = vtanh.f32 %v1248_v25  ;;  %v1252_v33 = vadd.f32 %v1251_v31, %v1076_v19  ;;  %v1253_v34 = vpop.f32.mrb[19].mxu1  ;;  %v1181_v35 = vadd.f32 %v1180_v32, %v1076_v19  ;;  %v1106_v28 = vpop.permute.xlu1 %1105 }
 0x3b7   : > { %2310 = vtanh.f32 %v1177_v26  ;;  %v1254_v36 = vadd.f32 %v1253_v34, %v1076_v19 }
 0x3b8   : > { %2312 = vtanh.f32 %v1250_v29 }
 0x3b9   : > { %2314 = vtanh.f32 %v1179_v30  ;;  %v1101_v30 = vpop.permute.xlu0 %1100 }
 0x3ba   : > { %2316 = vtanh.f32 %v1252_v33  ;;  %v1184_v58 = vpop.f32.mrb[20].mxu0 }
 0x3bb   : > { %2318 = vtanh.f32 %v1181_v35  ;;  %v1185_v39 = vadd.f32 %v1184_v58, %v1081_v38  ;;  %v1257_v40 = vpop.f32.mrb[20].mxu1  ;;  %v1186_v41 = vpop.f32.mrb[21].mxu0 }
 0x3bc   : > { %2320 = vtanh.f32 %v1254_v36  ;;  %v1258_v42 = vadd.f32 %v1257_v40, %v1081_v38  ;;  %v1187_v43 = vadd.f32 %v1186_v41, %v1081_v38  ;;  %v1259_v44 = vpop.f32.mrb[21].mxu1  ;;  %v1188_v45 = vpop.f32.mrb[22].mxu0 }
 0x3bd   : > { %2322 = vtanh.f32 %v1185_v39  ;;  %v1260_v59 = vadd.f32 %v1259_v44, %v1081_v38  ;;  %v1189_v60 = vadd.f32 %v1188_v45, %v1086_v37  ;;  %v1261_v46 = vpop.f32.mrb[22].mxu1  ;;  %v1190_v61 = vpop.f32.mrb[23].mxu0 }
 0x3be   : > { %2324 = vtanh.f32 %v1258_v42  ;;  %v1262_v47 = vadd.f32 %v1261_v46, %v1086_v37  ;;  %v1263_v48 = vpop.f32.mrb[23].mxu1  ;;  %v1191_v50 = vadd.f32 %v1190_v61, %v1086_v37 }
 0x3bf   : > { %v2307_v49 = vpop.eup %2306  ;;  %2326 = vtanh.f32 %v1187_v43  ;;  %v1264_v55 = vadd.f32 %v1263_v48, %v1086_v37 }
 0x3c0   : > { %v2309_v54 = vpop.eup %2308  ;;  %2328 = vtanh.f32 %v1260_v59 }
 0x3c1   : > { %v2311_v56 = vpop.eup %2310  ;;  %2330 = vtanh.f32 %v1189_v60 }
 0x3c2   : > { %v2313_v62 = vpop.eup %2312  ;;  %2332 = vtanh.f32 %v1262_v47  ;;  %v1194_v0 = vpop.f32.mrb[24].mxu0 }
 0x3c3   : > { %v2315_v2 = vpop.eup %2314  ;;  %2334 = vtanh.f32 %v1191_v50  ;;  %v1195_v3 = vadd.f32 %v1194_v0, %v1091_v63  ;;  %v1267_v4 = vpop.f32.mrb[24].mxu1 }
 0x3c4   : > { %v1196_v5 = vpop.f32.mrb[25].mxu0  ;;  %v2317_v6 = vpop.eup %2316  ;;  %2336 = vtanh.f32 %v1264_v55  ;;  %v1268_v7 = vadd.f32 %v1267_v4, %v1091_v63  ;;  %v1326_v11 = vpack.c.bf16 %v2315_v2, %v2307_v49 }
 0x3c5   : > { %v1197_v8 = vadd.f32 %v1196_v5, %v1091_v63  ;;  %v1269_v9 = vpop.f32.mrb[25].mxu1  ;;  %v1198_v10 = vpop.f32.mrb[26].mxu0  ;;  %2338 = vtanh.f32 %v1195_v3  ;;  %v1328_v17 = vpack.c.bf16 %v2317_v6, %v2309_v54 }
 0x3c6   : > { %v2319_v12 = vpop.eup %2318  ;;  %v1270_v13 = vadd.f32 %v1269_v9, %v1091_v63  ;;  %v1199_v14 = vadd.f32 %v1198_v10, %v1096_v57  ;;  %v1271_v15 = vpop.f32.mrb[26].mxu1  ;;  %2340 = vtanh.f32 %v1268_v7 }
 0x3c7   : > { %v1200_v16 = vpop.f32.mrb[27].mxu0  ;;  %v2321_v18 = vpop.eup %2320  ;;  %v1272_v19 = vadd.f32 %v1271_v15, %v1096_v57  ;;  %v1327_v21 = vpack.c.bf16 %v2319_v12, %v2311_v56  ;;  %2342 = vtanh.f32 %v1197_v8 }
 0x3c8   : > { %v1273_v20 = vpop.f32.mrb[27].mxu1  ;;  %v2323_v22 = vpop.eup %2322  ;;  %v1201_v23 = vadd.f32 %v1200_v16, %v1096_v57  ;;  %v1329_v24 = vpack.c.bf16 %v2321_v18, %v2313_v62  ;;  %2344 = vtanh.f32 %v1270_v13 }
 0x3c9   : > { %v2325_v25 = vpop.eup %2324  ;;  %v1274_v26 = vadd.f32 %v1273_v20, %v1096_v57  ;;  %1422 = vmatprep.subr.bf16.mxu0 %v1327_v21  ;;  %2346 = vtanh.f32 %v1199_v14  ;;  %v2175_v20 = vld [vmem:[#allocation15 + $0x8] sm:$0xff]   ;;  %v2176_v21 = vld [vmem:[#allocation15 + $0x10] sm:$0xff]  }
 0x3ca   : > { %v2327_v27 = vpop.eup %2326  ;;  %1495 = vmatprep.subr.bf16.mxu1 %v1329_v24  ;;  %1423 = vmatpush1.bf16.msra.mxu0 %v1326_v11  ;;  %2348 = vtanh.f32 %v1272_v19  ;;  %v1204_v31 = vpop.f32.mrb[28].mxu0  ;;  %v2174_v19 = vld [vmem:[#allocation15] sm:$0xff]  }
 0x3cb   : > { %v2329_v29 = vpop.eup %2328  ;;  %1496 = vmatpush1.bf16.msra.mxu1 %v1328_v17  ;;  %2350 = vtanh.f32 %v1201_v23  ;;  %v1205_v33 = vadd.f32 %v1204_v31, %v1101_v30  ;;  %v1277_v34 = vpop.f32.mrb[28].mxu1 }
 0x3cc   : > { %v2331_v32 = vpop.eup %2330  ;;  %v1206_v35 = vpop.f32.mrb[29].mxu0  ;;  %2352 = vtanh.f32 %v1274_v26  ;;  %v1278_v37 = vadd.f32 %v1277_v34, %v1101_v30 }
 0x3cd   : > { %v2333_v36 = vpop.eup %2332  ;;  %v1207_v38 = vadd.f32 %v1206_v35, %v1101_v30  ;;  %v1279_v58 = vpop.f32.mrb[29].mxu1  ;;  %v1330_v40 = vpack.c.bf16 %v2331_v32, %v2323_v22  ;;  %2354 = vtanh.f32 %v1205_v33  ;;  %v2177_v22 = vld [vmem:[#allocation15 + $0x18] sm:$0xff]  }
 0x3ce   : > { %v1208_v39 = vpop.f32.mrb[30].mxu0  ;;  %v2335_v41 = vpop.eup %2334  ;;  %v1280_v42 = vadd.f32 %v1279_v58, %v1101_v30  ;;  %v1332_v59 = vpack.c.bf16 %v2333_v36, %v2325_v25  ;;  %2356 = vtanh.f32 %v1278_v37 }
 0x3cf   : > { %v1209_v43 = vadd.f32 %v1208_v39, %v1106_v28  ;;  %v1281_v44 = vpop.f32.mrb[30].mxu1  ;;  %v1210_v45 = vpop.f32.mrb[31].mxu0  ;;  %v1331_v47 = vpack.c.bf16 %v2335_v41, %v2327_v27  ;;  %2358 = vtanh.f32 %v1207_v38 }
 0x3d0   : > { %v2337_v60 = vpop.eup %2336  ;;  %v1282_v46 = vadd.f32 %v1281_v44, %v1106_v28  ;;  %v1283_v61 = vpop.f32.mrb[31].mxu1  ;;  %v1211_v49 = vadd.f32 %v1210_v45, %v1106_v28  ;;  %2360 = vtanh.f32 %v1280_v42 }
 0x3d1   : > { %v2339_v48 = vpop.eup %2338  ;;  %v1333_v50 = vpack.c.bf16 %v2337_v60, %v2329_v29  ;;  %v1284_v55 = vadd.f32 %v1283_v61, %v1106_v28  ;;  %1424 = vmatprep.subr.bf16.mxu0 %v1331_v47  ;;  %2362 = vtanh.f32 %v1209_v43  ;;  %v1358_v23 = vpop.permute.xlu1 %1357 }
 0x3d2   : > { %v2341_v54 = vpop.eup %2340  ;;  %1425 = vmatpush1.bf16.msra.mxu0 %v1330_v40  ;;  %2364 = vtanh.f32 %v1282_v46  ;;  %v1353_v24 = vpop.permute.xlu0 %1352 }
 0x3d3   : > { %v2343_v56 = vpop.eup %2342  ;;  %1497 = vmatprep.subr.bf16.mxu1 %v1333_v50  ;;  %2366 = vtanh.f32 %v1211_v49 }
 0x3d4   : > { %v2345_v57 = vpop.eup %2344  ;;  %1498 = vmatpush1.bf16.msra.mxu1 %v1332_v59  ;;  %2368 = vtanh.f32 %v1284_v55 }
 0x3d5   : > { %v2347_v62 = vpop.eup %2346  ;;  %v1368_v25 = vpop.permute.xlu1 %1367 }
 0x3d6   : > { %v2349_v63 = vpop.eup %2348  ;;  %v1334_v0 = vpack.c.bf16 %v2347_v62, %v2339_v48  ;;  %v1363_v26 = vpop.permute.xlu0 %1362 }
 0x3d7   : > { %v2351_v2 = vpop.eup %2350  ;;  %v1336_v3 = vpack.c.bf16 %v2349_v63, %v2341_v54 }
 0x3d8   : > { %v2353_v4 = vpop.eup %2352  ;;  %v1335_v5 = vpack.c.bf16 %v2351_v2, %v2343_v56 }
 0x3d9   : > { %v2355_v6 = vpop.eup %2354  ;;  %v1337_v7 = vpack.c.bf16 %v2353_v4, %v2345_v57  ;;  %v3339_v27 = vpop.permute.xlu1 %1377 }
 0x3da   : > { %v2357_v8 = vpop.eup %2356  ;;  %1426 = vmatprep.subr.bf16.mxu0 %v1335_v5  ;;  %v3341_v28 = vpop.permute.xlu0 %1372 }
 0x3db   : > { %v2359_v9 = vpop.eup %2358  ;;  %1499 = vmatprep.subr.bf16.mxu1 %v1337_v7  ;;  %1427 = vmatpush1.bf16.msra.mxu0 %v1334_v0 }
 0x3dc   : > { %v2361_v10 = vpop.eup %2360  ;;  %1500 = vmatpush1.bf16.msra.mxu1 %v1336_v3 }
 0x3dd   : > { %v2363_v11 = vpop.eup %2362  ;;  %v3343_v43 = vpop.permute.xlu1 %1387 }
 0x3de   : > { %v2365_v12 = vpop.eup %2364  ;;  %v1338_v13 = vpack.c.bf16 %v2363_v11, %v2355_v6  ;;  %v3345_v44 = vpop.permute.xlu0 %1382 }
 0x3df   : > { %v2367_v14 = vpop.eup %2366  ;;  %v1340_v15 = vpack.c.bf16 %v2365_v12, %v2357_v8 }
 0x3e0   : > { %v2369_v16 = vpop.eup %2368  ;;  %v1339_v17 = vpack.c.bf16 %v2367_v14, %v2359_v9 }
 0x3e1   : > { %v1341_v18 = vpack.c.bf16 %v2369_v16, %v2361_v10  ;;  %v1616_v7 = vpop.permute.xlu1 %1615 }
 0x3e2   : > { %1428 = vmatprep.subr.bf16.mxu0 %v1339_v17  ;;  %v1611_v5 = vpop.permute.xlu0 %1610 }
 0x3e3   : > { %1501 = vmatprep.subr.bf16.mxu1 %v1341_v18  ;;  %1429 = vmatpush1.bf16.msra.mxu0 %v1338_v13 }
 0x3e4   : > { %1502 = vmatpush1.bf16.msra.mxu1 %v1340_v15 }
 0x3e6   : > { %2006 = vmatmul.mubr.msk.bf16.vlgmr.msra.gmra.mrb[32].mxu0 %vm845_vm0, %v2174_v19 }
 0x3e7   : > { %2010 = vmatmul.mubr.msk.bf16.vlgmr.msra.gmra.mrb[32].mxu1 %vm845_vm0, %v2174_v19  ;;  %1464 = vmatprep.mubr.bf16.mxu0 %v2818_v1 }
 0x3e8   : > { %1537 = vmatprep.mubr.bf16.mxu1 %v2818_v1 }
 0x3ee   : > { %2007 = vmatmul.mubr.msk.bf16.gmra.mrb[36].mxu0 %vm845_vm0, %v2175_v20 }
 0x3ef   : > { %2011 = vmatmul.mubr.msk.bf16.gmra.mrb[36].mxu1 %vm845_vm0, %v2175_v20  ;;  %1474 = vmatprep.mubr.bf16.mxu0 %v2818_v1 }
 0x3f0   : > { %1547 = vmatprep.mubr.bf16.mxu1 %v2818_v1 }
 0x3f6   : > { %2008 = vmatmul.mubr.msk.bf16.gmra.mrb[40].mxu0 %vm845_vm0, %v2176_v21 }
 0x3f7   : > { %2012 = vmatmul.mubr.msk.bf16.gmra.mrb[40].mxu1 %vm845_vm0, %v2176_v21  ;;  %1484 = vmatprep.mubr.bf16.mxu0 %v2818_v1 }
 0x3f8   : > { %1557 = vmatprep.mubr.bf16.mxu1 %v2818_v1 }
 0x3fe   : > { %2009 = vmatmul.mubr.msk.bf16.gmra.mrb[44].mxu0 %vm845_vm0, %v2177_v22 }
 0x3ff   : > { %2013 = vmatmul.mubr.msk.bf16.gmra.mrb[44].mxu1 %vm845_vm0, %v2177_v22 }
 0x4b9   : > { %v1456_v29 = vpop.f32.mrb[32].mxu0 }
 0x4ba   : > { %v1457_v30 = vadd.f32 %v1456_v29, %v1353_v24  ;;  %v1529_v31 = vpop.f32.mrb[32].mxu1  ;;  %v1458_v32 = vpop.f32.mrb[33].mxu0 }
 0x4bb   : > { %v1530_v33 = vadd.f32 %v1529_v31, %v1353_v24  ;;  %v1459_v34 = vadd.f32 %v1458_v32, %v1353_v24  ;;  %v1531_v1 = vpop.f32.mrb[33].mxu1  ;;  %v1460_v35 = vpop.f32.mrb[34].mxu0 }
 0x4bc   : > { %2370 = vtanh.f32 %v1457_v30  ;;  %v1532_v36 = vadd.f32 %v1531_v1, %v1353_v24  ;;  %v1461_v37 = vadd.f32 %v1460_v35, %v1358_v23  ;;  %v1533_v38 = vpop.f32.mrb[34].mxu1  ;;  %v1462_v58 = vpop.f32.mrb[35].mxu0 }
 0x4bd   : > { %2372 = vtanh.f32 %v1530_v33  ;;  %v1534_v39 = vadd.f32 %v1533_v38, %v1358_v23  ;;  %v1535_v40 = vpop.f32.mrb[35].mxu1  ;;  %v1463_v41 = vadd.f32 %v1462_v58, %v1358_v23 }
 0x4be   : > { %2374 = vtanh.f32 %v1459_v34  ;;  %v1536_v42 = vadd.f32 %v1535_v40, %v1358_v23 }
 0x4bf   : > { %2376 = vtanh.f32 %v1532_v36  ;;  %v1621_v36 = vpop.permute.xlu0 %1620 }
 0x4c0   : > { %2378 = vtanh.f32 %v1461_v37 }
 0x4c1   : > { %2380 = vtanh.f32 %v1534_v39  ;;  %v1466_v45 = vpop.f32.mrb[36].mxu0 }
 0x4c2   : > { %2382 = vtanh.f32 %v1463_v41  ;;  %v1467_v59 = vadd.f32 %v1466_v45, %v1363_v26  ;;  %v1539_v60 = vpop.f32.mrb[36].mxu1  ;;  %v1468_v46 = vpop.f32.mrb[37].mxu0 }
 0x4c3   : > { %2384 = vtanh.f32 %v1536_v42  ;;  %v1540_v61 = vadd.f32 %v1539_v60, %v1363_v26  ;;  %v1469_v47 = vadd.f32 %v1468_v46, %v1363_v26  ;;  %v1541_v48 = vpop.f32.mrb[37].mxu1  ;;  %v1470_v49 = vpop.f32.mrb[38].mxu0 }
 0x4c4   : > { %2386 = vtanh.f32 %v1467_v59  ;;  %v1542_v50 = vadd.f32 %v1541_v48, %v1363_v26  ;;  %v1471_v54 = vadd.f32 %v1470_v49, %v1368_v25  ;;  %v1543_v55 = vpop.f32.mrb[38].mxu1  ;;  %v1472_v56 = vpop.f32.mrb[39].mxu0 }
 0x4c5   : > { %2388 = vtanh.f32 %v1540_v61  ;;  %v1544_v57 = vadd.f32 %v1543_v55, %v1368_v25  ;;  %v1545_v62 = vpop.f32.mrb[39].mxu1  ;;  %v1473_v0 = vadd.f32 %v1472_v56, %v1368_v25  ;;  %v1626_v46 = vpop.permute.xlu1 %1625 }
 0x4c6   : > { %v2371_v63 = vpop.eup %2370  ;;  %2390 = vtanh.f32 %v1469_v47  ;;  %v1546_v3 = vadd.f32 %v1545_v62, %v1368_v25 }
 0x4c7   : > { %v2373_v2 = vpop.eup %2372  ;;  %2392 = vtanh.f32 %v1542_v50  ;;  %v1648_v8 = vmul.f32 %v2371_v63, %v1611_v5 }
 0x4c8   : > { %v2375_v4 = vpop.eup %2374  ;;  %2394 = vtanh.f32 %v1471_v54  ;;  %v1650_v9 = vmul.f32 %v2373_v2, %v1611_v5 }
 0x4c9   : > { %v2377_v6 = vpop.eup %2376  ;;  %2396 = vtanh.f32 %v1544_v57  ;;  %v1476_v10 = vpop.f32.mrb[40].mxu0  ;;  %v1649_v12 = vmul.f32 %v2375_v4, %v1611_v5 }
 0x4ca   : > { %v2379_v11 = vpop.eup %2378  ;;  %v1651_v13 = vmul.f32 %v2377_v6, %v1611_v5  ;;  %2398 = vtanh.f32 %v1473_v0  ;;  %v1477_v14 = vadd.f32 %v1476_v10, %v3341_v28  ;;  %v1549_v15 = vpop.f32.mrb[40].mxu1 }
 0x4cb   : > { %v1478_v16 = vpop.f32.mrb[41].mxu0  ;;  %v2381_v17 = vpop.eup %2380  ;;  %v1652_v18 = vmul.f32 %v2379_v11, %v1616_v7  ;;  %2400 = vtanh.f32 %v1546_v3  ;;  %v1550_v19 = vadd.f32 %v1549_v15, %v3341_v28 }
 0x4cc   : > { %v1479_v20 = vadd.f32 %v1478_v16, %v3341_v28  ;;  %v1551_v21 = vpop.f32.mrb[41].mxu1  ;;  %v1480_v22 = vpop.f32.mrb[42].mxu0  ;;  %v1654_v24 = vmul.f32 %v2381_v17, %v1616_v7  ;;  %2402 = vtanh.f32 %v1477_v14 }
 0x4cd   : > { %v2383_v23 = vpop.eup %2382  ;;  %v1552_v25 = vadd.f32 %v1551_v21, %v3341_v28  ;;  %v1481_v26 = vadd.f32 %v1480_v22, %v3339_v27  ;;  %v1553_v29 = vpop.f32.mrb[42].mxu1  ;;  %v1680_v32 = vadd.f32 %v1652_v18, %v1648_v8  ;;  %2404 = vtanh.f32 %v1550_v19 }
 0x4ce   : > { %v1482_v30 = vpop.f32.mrb[43].mxu0  ;;  %v2385_v31 = vpop.eup %2384  ;;  %v1653_v33 = vmul.f32 %v2383_v23, %v1616_v7  ;;  %v1554_v34 = vadd.f32 %v1553_v29, %v3339_v27  ;;  %v1706_v37 = vadd.f32 %v1654_v24, %v1650_v9  ;;  %2406 = vtanh.f32 %v1479_v20 }
 0x4cf   : > { %v1555_v1 = vpop.f32.mrb[43].mxu1  ;;  %v2387_v35 = vpop.eup %2386  ;;  %v1655_v38 = vmul.f32 %v2385_v31, %v1616_v7  ;;  %v1483_v58 = vadd.f32 %v1482_v30, %v3339_v27  ;;  %2408 = vtanh.f32 %v1552_v25 }
 0x4d0   : > { %v2389_v39 = vpop.eup %2388  ;;  %v1693_v28 = vadd.f32 %v1653_v33, %v1649_v12  ;;  %v1656_v40 = vmul.f32 %v2387_v35, %v1621_v36  ;;  %v1556_v41 = vadd.f32 %v1555_v1, %v3339_v27  ;;  %2410 = vtanh.f32 %v1481_v26  ;;  %v1631_v16 = vpop.permute.xlu0 %1630 }
 0x4d1   : > { %v2391_v42 = vpop.eup %2390  ;;  %v1719_v45 = vadd.f32 %v1655_v38, %v1651_v13  ;;  %v1658_v59 = vmul.f32 %v2389_v39, %v1621_v36  ;;  %2412 = vtanh.f32 %v1554_v34  ;;  %v1486_v48 = vpop.f32.mrb[44].mxu0 }
 0x4d2   : > { %v2393_v60 = vpop.eup %2392  ;;  %v1681_v61 = vadd.f32 %v1680_v32, %v1656_v40  ;;  %v1657_v47 = vmul.f32 %v2391_v42, %v1621_v36  ;;  %2414 = vtanh.f32 %v1483_v58  ;;  %v1487_v55 = vadd.f32 %v1486_v48, %v3345_v44  ;;  %v1559_v56 = vpop.f32.mrb[44].mxu1 }
 0x4d3   : > { %v2395_v49 = vpop.eup %2394  ;;  %v1707_v50 = vadd.f32 %v1706_v37, %v1658_v59  ;;  %v1659_v54 = vmul.f32 %v2393_v60, %v1621_v36  ;;  %v1488_v57 = vpop.f32.mrb[45].mxu0  ;;  %2416 = vtanh.f32 %v1556_v41  ;;  %v1560_v0 = vadd.f32 %v1559_v56, %v3345_v44 }
 0x4d4   : > { %v2397_v62 = vpop.eup %2396  ;;  %v1694_v27 = vadd.f32 %v1693_v28, %v1657_v47  ;;  %v1660_v63 = vmul.f32 %v2395_v49, %v1626_v46  ;;  %v1561_v2 = vpop.f32.mrb[45].mxu1  ;;  %2418 = vtanh.f32 %v1487_v55  ;;  %v1489_v7 = vadd.f32 %v1488_v57, %v3345_v44 }
 0x4d5   : > { %v1490_v3 = vpop.f32.mrb[46].mxu0  ;;  %v2399_v4 = vpop.eup %2398  ;;  %v1720_v5 = vadd.f32 %v1719_v45, %v1659_v54  ;;  %v1662_v6 = vmul.f32 %v2397_v62, %v1626_v46  ;;  %2420 = vtanh.f32 %v1560_v0  ;;  %v1562_v13 = vadd.f32 %v1561_v2, %v3345_v44 }
 0x4d6   : > { %v1563_v8 = vpop.f32.mrb[46].mxu1  ;;  %v1492_v9 = vpop.f32.mrb[47].mxu0  ;;  %v1682_v11 = vadd.f32 %v1681_v61, %v1660_v63  ;;  %v1661_v12 = vmul.f32 %v2399_v4, %v1626_v46  ;;  %2422 = vtanh.f32 %v1489_v7  ;;  %v1491_v19 = vadd.f32 %v1490_v3, %v3343_v43 }
 0x4d7   : > { %v2401_v10 = vpop.eup %2400  ;;  %v1565_v14 = vpop.f32.mrb[47].mxu1  ;;  %v1708_v17 = vadd.f32 %v1707_v50, %v1662_v6  ;;  %2424 = vtanh.f32 %v1562_v13  ;;  %v1564_v23 = vadd.f32 %v1563_v8, %v3343_v43  ;;  %v1493_v44 = vadd.f32 %v1492_v9, %v3343_v43 }
 0x4d8   : > { %v2403_v15 = vpop.eup %2402  ;;  %v1663_v18 = vmul.f32 %v2401_v10, %v1626_v46  ;;  %v1695_v21 = vadd.f32 %v1694_v27, %v1661_v12  ;;  %2426 = vtanh.f32 %v1491_v19  ;;  %v1566_v32 = vadd.f32 %v1565_v14, %v3343_v43  ;;  %v1636_v34 = vpop.permute.xlu1 %1635 }
 0x4d9   : > { %v2405_v20 = vpop.eup %2404  ;;  %v1664_v22 = vmul.f32 %v2403_v15, %v1631_v16  ;;  %2428 = vtanh.f32 %v1564_v23  ;;  %v1641_v59 = vpop.permute.xlu0 %1640 }
 0x4da   : > { %v2407_v24 = vpop.eup %2406  ;;  %v1721_v25 = vadd.f32 %v1720_v5, %v1663_v18  ;;  %v1666_v26 = vmul.f32 %v2405_v20, %v1631_v16  ;;  %2430 = vtanh.f32 %v1493_v44 }
 0x4db   : > { %v2409_v29 = vpop.eup %2408  ;;  %v1683_v30 = vadd.f32 %v1682_v11, %v1664_v22  ;;  %v1665_v31 = vmul.f32 %v2407_v24, %v1631_v16  ;;  %2432 = vtanh.f32 %v1566_v32 }
 0x4dc   : > { %v2411_v33 = vpop.eup %2410  ;;  %v1709_v1 = vadd.f32 %v1708_v17, %v1666_v26  ;;  %v1667_v35 = vmul.f32 %v2409_v29, %v1631_v16  ;;  %v1646_v62 = vpop.permute.xlu1 %1645  ;;  %v2819_v26 = vmov 1966171168  }
 0x4dd   : > { %v2413_v36 = vpop.eup %2412  ;;  %v1696_v37 = vadd.f32 %v1695_v21, %v1665_v31  ;;  %v1668_v38 = vmul.f32 %v2411_v33, %v1636_v34  ;;  %v1753_v44 = vunpack.c.l.s4 %v2819_v26  ;;  %v1736_v29 = vpop.permute.xlu0 %1735 }
 0x4de   : > { %v2415_v58 = vpop.eup %2414  ;;  %v1722_v39 = vadd.f32 %v1721_v25, %v1667_v35  ;;  %v1670_v28 = vmul.f32 %v2413_v36, %v1636_v34  ;;  %v1741_v35 = vrot.slane %v1736_v29, %v591_v53 }
 0x4df   : > { %v2417_v40 = vpop.eup %2416  ;;  %v1684_v41 = vadd.f32 %v1683_v30, %v1668_v38  ;;  %v1669_v42 = vmul.f32 %v2415_v58, %v1636_v34  ;;  %v1754_v38 = vunpack.c.0.s8 %v1753_v44 }
 0x4e0   : > { %v2419_v45 = vpop.eup %2418  ;;  %v1710_v60 = vadd.f32 %v1709_v1, %v1670_v28  ;;  %v1671_v46 = vmul.f32 %v2417_v40, %v1636_v34 }
 0x4e1   : > { %v2421_v43 = vpop.eup %2420  ;;  %v1697_v61 = vadd.f32 %v1696_v37, %v1669_v42  ;;  %v1672_v47 = vmul.f32 %v2419_v45, %v1641_v59 }
 0x4e2   : > { %v2423_v48 = vpop.eup %2422  ;;  %v1723_v49 = vadd.f32 %v1722_v39, %v1671_v46  ;;  %v1674_v50 = vmul.f32 %v2421_v43, %v1641_v59 }
 0x4e3   : > { %v2425_v54 = vpop.eup %2424  ;;  %v1685_v55 = vadd.f32 %v1684_v41, %v1672_v47  ;;  %v1673_v56 = vmul.f32 %v2423_v48, %v1641_v59 }
 0x4e4   : > { %v2427_v57 = vpop.eup %2426  ;;  %v1711_v27 = vadd.f32 %v1710_v60, %v1674_v50  ;;  %v1675_v63 = vmul.f32 %v2425_v54, %v1641_v59  ;;  %v1757_v59 = vsub.s32 %v1754_v38, %v3244_v52 }
 0x4e5   : > { %v2429_v0 = vpop.eup %2428  ;;  %v1698_v2 = vadd.f32 %v1697_v61, %v1673_v56  ;;  %v1676_v3 = vmul.f32 %v2427_v57, %v1646_v62 }
 0x4e6   : > { %v2431_v4 = vpop.eup %2430  ;;  %v1724_v5 = vadd.f32 %v1723_v49, %v1675_v63  ;;  %v1678_v6 = vmul.f32 %v2429_v0, %v1646_v62 }
 0x4e7   : > { %v2433_v7 = vpop.eup %2432  ;;  %v1686_v8 = vadd.f32 %v1685_v55, %v1676_v3  ;;  %v1677_v9 = vmul.f32 %v2431_v4, %v1646_v62 }
 0x4e8   : > { %v1712_v10 = vadd.f32 %v1711_v27, %v1678_v6  ;;  %v1679_v11 = vmul.f32 %v2433_v7, %v1646_v62 }
 0x4e9   : > { %v1687_v12 = vrot.slane %v1686_v8, 4  ;;  %v1699_v13 = vadd.f32 %v1698_v2, %v1677_v9 }
 0x4ea   : > { %v1713_v14 = vrot.slane %v1712_v10, 4  ;;  %v1725_v15 = vadd.f32 %v1724_v5, %v1679_v11 }
 0x4eb   : > { %v1688_v16 = vadd.f32 %v1687_v12, %v1686_v8  ;;  %v1700_v17 = vrot.slane %v1699_v13, 4 }
 0x4ec   : > { %v1714_v18 = vadd.f32 %v1713_v14, %v1712_v10  ;;  %v1726_v19 = vrot.slane %v1725_v15, 4 }
 0x4ed   : > { %v1689_v20 = vrot.slane %v1688_v16, 2  ;;  %v1701_v21 = vadd.f32 %v1700_v17, %v1699_v13 }
 0x4ee   : > { %v1715_v22 = vrot.slane %v1714_v18, 2  ;;  %v1727_v23 = vadd.f32 %v1726_v19, %v1725_v15 }
 0x4ef   : > { %v1690_v24 = vadd.f32 %v1689_v20, %v1688_v16  ;;  %v1702_v25 = vrot.slane %v1701_v21, 2 }
 0x4f0   : > { %v1716_v30 = vadd.f32 %v1715_v22, %v1714_v18  ;;  %v1728_v31 = vrot.slane %v1727_v23, 2 }
 0x4f1   : > { %v1691_v32 = vrot.slane %v1690_v24, 1  ;;  %v1703_v33 = vadd.f32 %v1702_v25, %v1701_v21 }
 0x4f2   : > { %v1717_v34 = vrot.slane %v1716_v30, 1  ;;  %v1729_v1 = vadd.f32 %v1728_v31, %v1727_v23 }
 0x4f3   : > { %v1692_v36 = vadd.f32 %v1691_v32, %v1690_v24  ;;  %v1704_v37 = vrot.slane %v1703_v33, 1 }
 0x4f4   : > { %v1718_v58 = vadd.f32 %v1717_v34, %v1716_v30  ;;  %v1730_v39 = vrot.slane %v1729_v1, 1 }
 0x4f5   : > { %v1705_v28 = vadd.f32 %v1704_v37, %v1703_v33  ;;  %v1742_v40 = vadd.f32 %v1741_v35, %v1692_v36 }
 0x4f6   : > { %v1731_v41 = vadd.f32 %v1730_v39, %v1729_v1  ;;  %v1744_v42 = vadd.f32 %v1741_v35, %v1718_v58 }
 0x4f7   : > { %v1743_v45 = vadd.f32 %v1741_v35, %v1705_v28 }
 0x4f8   : > { %v1745_v60 = vadd.f32 %v1741_v35, %v1731_v41 }
 0x4f9   : > { %v1750_v46 = vcombine.low %v1742_v40, %v1743_v45 }
 0x4fa   : > { %v1751_v43 = vcombine.low %v1744_v42, %v1745_v60 }
 0x4fb   : > { %v1758_v53 = vrot.slane %v1750_v46, %v1757_v59 }
 0x4fc   : > { %v1765_v61 = vrot.slane %v1751_v43, %v1757_v59 }
 0x4fe   : > { %v1766_v47 = vcombine.low %v1758_v53, %v1765_v61 }
 0x500   : > { %v1773_v48 = vrot.slane %v1766_v47, %v1757_v59 }
 0x502   : > { %1779 = vst.msk [vmem:[%s535_s15] sm:$0xf] %vm1777_vm1, %v1773_v48 }
 0x503   : > { %2729 = shalt.err (!%p2726_p8)
}
 0x504   : > { %s2730_s23 = scalar_lea.hbm %s3373_s30, 64  ;;  %s2734_s15 = scalar_lea.hbm %s3464_s12, 128 }
 0x505   : > { %p2731_p0 = scmp.ne.s32.totalorder %s3373_s30, %s2730_s23  ;;  %p2735_p7 = scmp.lt.u32.totalorder %s3373_s30, %s3464_s12 }
 0x506   : > { %p2736_p10 = scmp.lt.u32.totalorder %s2734_s15, %s2730_s23  ;;  %p2738_p11 = scmp.lt.u32.totalorder %s2730_s23, %s3373_s30 }
 0x507   : > { %p2732_p5 = pnand %p2731_p0, %p3465_p12 }
 0x508   : > { %p2737_p1 = por %p2736_p10, %p2735_p7 }
 0x509   : > { %p2733_p2 = pneg %p2732_p5 }
 0x50a   : > { %p2739_p13 = por %p2738_p11, %p2737_p1 }
 0x50c   : > { %p2740_p3 = pnand %p2739_p13, %p2733_p2 }
 0x50e   : > { %2743 = shalt.err (!%p2740_p3)
}
 0x50f   : > { %2059 = dma.vmem_to_hbm [thread:$0]  (%p3465_p12), %s3375_s1, 64, %s3373_s30, %s1781_s26  }
 0x510 PF: > { %s1807_s24 = sand.u32 1, %s2790_s19   ;;  %p3466_p6 = scmp.ne.s32.totalorder %s3450_s16, 0 }
 0x511   : > { %p3467_p9 = scmp.ge.s32.totalorder %s2802_s22, 2  ;;  %s1808_s18 = scalar_lea.sflag [#allocation5], %s1807_s24 }
 0x513   : > { %p2094_p4 = pnand %p3467_p9, %p3466_p6 }
 0x515   : > { %2785 = dma.done.wait (!%p2094_p4), %s1808_s18, 64  }
 0x516   : > { %2787 = vsyncadd (!%p2094_p4), %s1808_s18, 4294967232  ;;  %p31_p8 = scmp.ge.s32.totalorder %s3137_s17, 4   ;;  %s3468_s19 = smov %s2794_s20 }
 0x517   : > { %s3469_s20 = smov %s2798_s21  ;;  %s3470_s21 = smov %s3149_s29 }
 0x518   : > { %s3471_s22 = smov %s3137_s17  ;;  %33 = sbr.rel (!%p31_p8) target bundleno = 13 (0xd), region = 145 }
 0x51f   :  { %1813 = vsyncpa [#allocation4], 1 }
 0x520   :  { %1815 = vsyncpa [#allocation4 + $0x1], 1 }
 0x521   :  { %1816 = vsyncpa [#allocation7], 1 }
 0x522   :  { %1817 = vsyncpa [#allocation10], 1 }
 0x523   :  { %1818 = vsyncpa [#allocation13], 1 }
 0x524   :  { %1819 = vsyncpa [#allocation16], 1 }
 0x525   :  { %1820 = vsyncpa [#allocation19], 1 }
 0x526   :  { %1821 = vsyncpa [#allocation5], 1 }
 0x527   :  { %1823 = vsyncpa [#allocation5 + $0x1], 1 }

</bundles_post_ra>
